<compile_context>
chip_gen: v6e
topology: v6e:2x2x1
jax: 0.10.0
libtpu: 0.0.40
codegen_flags: <defaults>
</compile_context>

<pallas_src>
import functools
import math

import numpy as np
import jax
import jax.numpy as jnp
from jax.experimental import pallas as pl
from jax.experimental.pallas import tpu as pltpu

EPS = 1e-5


# ----------------------------------------------------------------------------
# Pallas kernel
# ----------------------------------------------------------------------------
def _attn3_kernel(x_ref, bns_ref, bnb_ref, w3_ref, w1_ref,
                  sgs_ref, sgb_ref, sgw_ref, sgc_ref,
                  pool_ref, up_ref, o_ref, *, L, Ls):
    f32 = jnp.float32
    C_pad, BL = x_ref.shape          # channels (padded) x (B_blk * L) lanes
    BLs = up_ref.shape[0]            # (B_blk * Ls) padded to a 128 multiple

    def mm(a, b):
        return jnp.dot(a, b, preferred_element_type=f32)

    def shifted(v, first_m, last_m, fill):
        # out_l[:, l] = v[:, l-1], out_r[:, l] = v[:, l+1]; per-sample edges
        # (and cross-sample lanes) replaced by `fill`.  roll -> XLU, mask -> VPU.
        n = v.shape[-1]
        lft = jnp.where(first_m, fill, pltpu.roll(v, 1, axis=1))
        rgt = jnp.where(last_m, fill, pltpu.roll(v, n - 1, axis=1))
        return lft, rgt

    def bn_relu(v, i, j):
        # folded eval-mode BatchNorm followed by ReLU
        return jnp.maximum(v * bns_ref[i, j] + bnb_ref[i, j], 0.0)

    def conv3(v, i, j, first_m, last_m):
        # 1-D conv, kernel=3, stride=1, pad=1, no bias.
        lft, rgt = shifted(v, first_m, last_m, 0.0)
        return (mm(w3_ref[i, j, 0], lft)
                + mm(w3_ref[i, j, 1], v)
                + mm(w3_ref[i, j, 2], rgt))

    def pru(v, i, first_m, last_m):
        # PreActResidualUnit (stride=1): residual path + 1x1 conv shortcut.
        y = bn_relu(v, i, 0)
        y = conv3(y, i, 0, first_m, last_m)
        y = bn_relu(y, i, 1)
        y = conv3(y, i, 1, first_m, last_m)
        return y + mm(w1_ref[i], v)

    # Per-sample edge masks (samples are concatenated along the lane axis).
    pos_l = jax.lax.broadcasted_iota(jnp.int32, (C_pad, BL), 1) % L
    first_l, last_l = pos_l == 0, pos_l == L - 1
    pos_s = jax.lax.broadcasted_iota(jnp.int32, (C_pad, BLs), 1) % Ls
    first_s, last_s = pos_s == 0, pos_s == Ls - 1

    x = x_ref[...]                                              # (C_pad, BL)

    xp = pru(x, 0, first_l, last_l)                             # pre
    xt = pru(pru(xp, 1, first_l, last_l), 2, first_l, last_l)   # trunk (2)

    # max_pool1d(k=3, s=2, p=1): roll+max, then a single down-select matmul.
    lft, rgt = shifted(xp, first_l, last_l, -jnp.inf)
    xs = mm(jnp.maximum(jnp.maximum(lft, xp), rgt), pool_ref[...])  # (C,BLs)

    xs = pru(xs, 3, first_s, last_s)        # soft_resdown1
    xs = pru(xs, 4, first_s, last_s)        # soft_resup2
    xs = mm(xs, up_ref[...])                # nearest upsample -> (C_pad, BL)

    # sigmoid branch: BN-ReLU-Conv1x1(+b) -> BN-ReLU-Conv1x1(+b) -> sigmoid
    a = jnp.maximum(xs * sgs_ref[0] + sgb_ref[0], 0.0)
    a = mm(sgw_ref[0], a) + sgc_ref[0]
    a = jnp.maximum(a * sgs_ref[1] + sgb_ref[1], 0.0)
    a = mm(sgw_ref[1], a) + sgc_ref[1]
    xsig = pl.reciprocal(1.0 + jnp.exp(-a), approx=False)

    o_ref[...] = pru((1.0 + xsig) * xt, 5, first_l, last_l)     # last


# ----------------------------------------------------------------------------
# Wrapper
# ----------------------------------------------------------------------------
def attention_module3_pallas(x, params):
    N, C, L = x.shape
    Ls = (L - 1) // 2 + 1
    C_pad = -(-C // 8) * 8                       # sublane-dense channels
    B_blk = 128 // math.gcd(L, 128)              # lane-dense: B_blk*L % 128 == 0
    N_pad = -(-N // B_blk) * B_blk
    BL = B_blk * L
    BLs_pad = -(-(B_blk * Ls) // 128) * 128      # keep rolled lane dims aligned

    kp = pack_params(params, C, C_pad, L, Ls, B_blk, BLs_pad)

    # (N, C, L) -> zero-pad -> (C_pad, N_pad*L): batch concatenated on lanes.
    xpad = jnp.pad(x, ((0, N_pad - N), (0, C_pad - C), (0, 0)))
    x2d = jnp.transpose(xpad, (1, 0, 2)).reshape(C_pad, N_pad * L)

    names = ("bns", "bnb", "w3", "w1", "sgs", "sgb", "sgw", "sgc", "pool", "up")
    args = [kp[k] for k in names]

    def full_spec(a):
        nd = a.ndim
        return pl.BlockSpec(a.shape, lambda n, _nd=nd: (0,) * _nd)

    in_specs = [pl.BlockSpec((C_pad, BL), lambda n: (0, n))]
    in_specs += [full_spec(a) for a in args]

    # VMEM budget: resident weights + double-buffered in/out tiles + headroom.
    args_bytes = sum(int(a.size) * a.dtype.itemsize for a in args)
    tile_bytes = C_pad * BL * 4
    vmem_limit = int(min(48 << 20, max(16 << 20, 4 * (args_bytes + 4 * tile_bytes))))

    kern = functools.partial(_attn3_kernel, L=L, Ls=Ls)

    out2d = pl.pallas_call(
        kern,
        out_shape=jax.ShapeDtypeStruct((C_pad, N_pad * L), jnp.float32),
        grid=(N_pad // B_blk,),
        in_specs=in_specs,
        out_specs=pl.BlockSpec((C_pad, BL), lambda n: (0, n)),
        compiler_params=pltpu.CompilerParams(
            dimension_semantics=("parallel",),
            vmem_limit_bytes=vmem_limit),
    )(x2d, *args)

    out = out2d.reshape(C_pad, N_pad, L).transpose(1, 0, 2)
    return out[:N, :C, :]


# ----------------------------------------------------------------------------
# Deterministic parameter init (shapes follow the PyTorch __init__)
# ----------------------------------------------------------------------------
def _bn_init(key, C):
    k1, k2, k3, k4 = jax.random.split(key, 4)
    gamma = jax.random.uniform(k1, (C,), jnp.float32, 0.5, 1.5)
    beta = 0.1 * jax.random.normal(k2, (C,), jnp.float32)
    mean = 0.1 * jax.random.normal(k3, (C,), jnp.float32)
    var = jax.random.uniform(k4, (C,), jnp.float32, 0.5, 1.5)
    return (gamma, beta, mean, var)


def _pru_init(key, C):
    k = jax.random.split(key, 5)
    return dict(
        bn1=_bn_init(k[0], C),
        bn2=_bn_init(k[1], C),
        w1=0.3 * jax.random.normal(k[2], (C, C, 3), jnp.float32),
        w2=0.3 * jax.random.normal(k[3], (C, C, 3), jnp.float32),
        ws=0.3 * jax.random.normal(k[4], (C, C, 1), jnp.float32),
    )


def _sig_init(key, C):
    k = jax.random.split(key, 6)
    return dict(
        bn1=_bn_init(k[0], C), bn2=_bn_init(k[1], C),
        w1=0.3 * jax.random.normal(k[2], (C, C, 1), jnp.float32),
        b1=0.1 * jax.random.normal(k[3], (C,), jnp.float32),
        w2=0.3 * jax.random.normal(k[4], (C, C, 1), jnp.float32),
        b2=0.1 * jax.random.normal(k[5], (C,), jnp.float32),
    )


def init_params(key, C):
    names = ["pre", "trunk0", "trunk1", "down", "up", "last"]
    keys = jax.random.split(key, len(names) + 1)
    params = {n: _pru_init(k, C) for n, k in zip(names, keys[:-1])}
    params["sig"] = _sig_init(keys[-1], C)
    return params


def _fold_bn(p):
    g, b, m, v = p
    s = g / jnp.sqrt(v + EPS)
    return s, b - m * s


def build_structural_mats(L, Ls, B_blk, BLs_pad):
    # Block-diagonal one-hot matrices: max-pool down-select (every 2nd lane of
    # each sample) and nearest-neighbour upsample.  Built per lane-block only.
    BL = B_blk * L
    pool = np.zeros((BL, BLs_pad), np.float32)
    up = np.zeros((BLs_pad, BL), np.float32)
    for b in range(B_blk):
        for lp in range(Ls):
            pool[b * L + 2 * lp, b * Ls + lp] = 1.0
        for i in range(L):
            up[b * Ls + (i * Ls) // L, b * L + i] = 1.0
    return jnp.asarray(pool), jnp.asarray(up)


def pack_params(params, C, C_pad, L, Ls, B_blk, BLs_pad):
    order = ["pre", "trunk0", "trunk1", "down", "up", "last"]
    pc = C_pad - C

    def padw(w):                       # (C, C) -> (C_pad, C_pad)
        return jnp.pad(w, ((0, pc), (0, pc)))

    def padv(v):                       # (C,) -> (C_pad,)
        return jnp.pad(v, (0, pc))

    bns, bnb, w3, w1 = [], [], [], []
    for n in order:
        p = params[n]
        s1, o1 = _fold_bn(p["bn1"])
        s2, o2 = _fold_bn(p["bn2"])
        bns.append(jnp.stack([padv(s1), padv(s2)]))
        bnb.append(jnp.stack([padv(o1), padv(o2)]))
        taps1 = jnp.stack([padw(p["w1"][:, :, t]) for t in range(3)])
        taps2 = jnp.stack([padw(p["w2"][:, :, t]) for t in range(3)])
        w3.append(jnp.stack([taps1, taps2]))
        w1.append(padw(p["ws"][:, :, 0]))

    sg = params["sig"]
    ss1, so1 = _fold_bn(sg["bn1"])
    ss2, so2 = _fold_bn(sg["bn2"])
    pool, up = build_structural_mats(L, Ls, B_blk, BLs_pad)
    return dict(
        bns=jnp.stack(bns)[..., None],                 # (6, 2, C_pad, 1)
        bnb=jnp.stack(bnb)[..., None],                 # (6, 2, C_pad, 1)
        w3=jnp.stack(w3),                              # (6, 2, 3, C_pad, C_pad)
        w1=jnp.stack(w1),                              # (6, C_pad, C_pad)
        sgs=jnp.stack([padv(ss1), padv(ss2)])[..., None],
        sgb=jnp.stack([padv(so1), padv(so2)])[..., None],
        sgw=jnp.stack([padw(sg["w1"][:, :, 0]), padw(sg["w2"][:, :, 0])]),
        sgc=jnp.stack([padv(sg["b1"]), padv(sg["b2"])])[..., None],
        pool=pool, up=up,
    )


# ----------------------------------------------------------------------------
# Pure-JAX reference (mirrors the PyTorch forward, eval-mode BN)
# ----------------------------------------------------------------------------
def _conv1d_ref(x, w, bias=None, padding=0):
    out = jax.lax.conv_general_dilated(
        x, w, window_strides=(1,), padding=[(padding, padding)],
        dimension_numbers=("NCH", "OIH", "NCH"))
    if bias is not None:
        out = out + bias[None, :, None]
    return out


def _bn_ref(x, p):
    g, b, m, v = p
    return (x - m[None, :, None]) * (g / jnp.sqrt(v + EPS))[None, :, None] \
        + b[None, :, None]


def _pru_ref(x, p):
    y = jax.nn.relu(_bn_ref(x, p["bn1"]))
    y = _conv1d_ref(y, p["w1"], padding=1)
    y = jax.nn.relu(_bn_ref(y, p["bn2"]))
    y = _conv1d_ref(y, p["w2"], padding=1)
    return y + _conv1d_ref(x, p["ws"], padding=0)


def attention3_ref(x, params):
    x = _pru_ref(x, params["pre"])
    L = x.shape[2]
    Ls = (L - 1) // 2 + 1
    xt = _pru_ref(_pru_ref(x, params["trunk0"]), params["trunk1"])
    xpad = jnp.pad(x, ((0, 0), (0, 0), (1, 1)), constant_values=-jnp.inf)
    xs = jnp.maximum(jnp.maximum(xpad[:, :, 0:2 * Ls:2],
                                 xpad[:, :, 1:2 * Ls + 1:2]),
                     xpad[:, :, 2:2 * Ls + 2:2])
    xs = _pru_ref(xs, params["down"])
    xs = _pru_ref(xs, params["up"])
    idx = (jnp.arange(L) * Ls) // L
    xs = xs[:, :, idx]
    sg = params["sig"]
    a = jax.nn.relu(_bn_ref(xs, sg["bn1"]))
    a = _conv1d_ref(a, sg["w1"], bias=sg["b1"], padding=0)
    a = jax.nn.relu(_bn_ref(a, sg["bn2"]))
    a = _conv1d_ref(a, sg["w2"], bias=sg["b2"], padding=0)
    a = jax.nn.sigmoid(a)
    x = (1.0 + a) * xt
    return _pru_ref(x, params["last"])


# ----------------------------------------------------------------------------
if __name__ == "__main__":
    N, C, L = 2, 4, 16
    key = jax.random.PRNGKey(0)
    kx, kp = jax.random.split(key)
    x = jax.random.normal(kx, (N, C, L), jnp.float32)

    params = init_params(kp, C)

    out = attention_module3_pallas(x, params)
    out = jax.block_until_ready(out)

    ref = attention3_ref(x, params)
    np.testing.assert_allclose(np.asarray(out), np.asarray(ref),
                               rtol=1e-4, atol=1e-4)
    print("KERNEL_OK")
</pallas_src>

<mosaic_0001>
module attributes {stable_mosaic.version = 11 : i64} {
  func.func @_attn3_kernel(%arg0: i32, %arg1: memref<8x128xf32, #tpu.memory_space<vmem>>, %arg2: memref<6x2x8x1xf32, #tpu.memory_space<vmem>>, %arg3: memref<6x2x8x1xf32, #tpu.memory_space<vmem>>, %arg4: memref<6x2x3x8x8xf32, #tpu.memory_space<vmem>>, %arg5: memref<6x8x8xf32, #tpu.memory_space<vmem>>, %arg6: memref<2x8x1xf32, #tpu.memory_space<vmem>>, %arg7: memref<2x8x1xf32, #tpu.memory_space<vmem>>, %arg8: memref<2x8x8xf32, #tpu.memory_space<vmem>>, %arg9: memref<2x8x1xf32, #tpu.memory_space<vmem>>, %arg10: memref<128x128xf32, #tpu.memory_space<vmem>>, %arg11: memref<128x128xf32, #tpu.memory_space<vmem>>, %arg12: memref<8x128xf32, #tpu.memory_space<vmem>>) attributes {dimension_semantics = [#tpu.dimension_semantics<parallel>], iteration_bounds = array<i64: 1>, scalar_prefetch = 0 : i64, scratch_operands = 0 : i64, tpu.core_type = #tpu.core_type<tc>, window_params = [{transform_indices = @transform_0, window_bounds = array<i64: 8, 128>}, {pipeline_mode = #tpu.pipeline_mode<synchronous>, transform_indices = @transform_1, window_bounds = array<i64: 6, 2, 8, 1>}, {pipeline_mode = #tpu.pipeline_mode<synchronous>, transform_indices = @transform_2, window_bounds = array<i64: 6, 2, 8, 1>}, {pipeline_mode = #tpu.pipeline_mode<synchronous>, transform_indices = @transform_3, window_bounds = array<i64: 6, 2, 3, 8, 8>}, {pipeline_mode = #tpu.pipeline_mode<synchronous>, transform_indices = @transform_4, window_bounds = array<i64: 6, 8, 8>}, {pipeline_mode = #tpu.pipeline_mode<synchronous>, transform_indices = @transform_5, window_bounds = array<i64: 2, 8, 1>}, {pipeline_mode = #tpu.pipeline_mode<synchronous>, transform_indices = @transform_6, window_bounds = array<i64: 2, 8, 1>}, {pipeline_mode = #tpu.pipeline_mode<synchronous>, transform_indices = @transform_7, window_bounds = array<i64: 2, 8, 8>}, {pipeline_mode = #tpu.pipeline_mode<synchronous>, transform_indices = @transform_8, window_bounds = array<i64: 2, 8, 1>}, {pipeline_mode = #tpu.pipeline_mode<synchronous>, transform_indices = @transform_9, window_bounds = array<i64: 128, 128>}, {pipeline_mode = #tpu.pipeline_mode<synchronous>, transform_indices = @transform_10, window_bounds = array<i64: 128, 128>}, {transform_indices = @transform_11, window_bounds = array<i64: 8, 128>}]} {
    %0 = tpu.iota {dimensions = array<i32: 1>} : vector<8x128xi32>
    %c16_i32 = arith.constant 16 : i32
    %c0_i32 = arith.constant 0 : i32
    %1 = arith.cmpi eq, %c16_i32, %c0_i32 : i32
    %c1_i32 = arith.constant 1 : i32
    %2 = arith.select %1, %c1_i32, %c16_i32 : i32
    %3 = vector.broadcast %2 : i32 to vector<8x128xi32>
    %4 = arith.remsi %0, %3 : vector<8x128xi32>
    %c0_i32_0 = arith.constant 0 : i32
    %5 = vector.broadcast %c0_i32_0 : i32 to vector<8x128xi32>
    %6 = arith.cmpi ne, %4, %5 : vector<8x128xi32>
    %c0_i32_1 = arith.constant 0 : i32
    %7 = vector.broadcast %c0_i32_1 : i32 to vector<8x128xi32>
    %8 = arith.cmpi slt, %4, %7 : vector<8x128xi32>
    %c0_i32_2 = arith.constant 0 : i32
    %9 = arith.cmpi slt, %2, %c0_i32_2 : i32
    %10 = vector.broadcast %9 : i1 to vector<8x128xi1>
    %11 = vector.broadcast %10 : vector<8x128xi1> to vector<8x128xi1>
    %12 = arith.xori %8, %11 : vector<8x128xi1>
    %13 = arith.andi %12, %6 : vector<8x128xi1>
    %14 = vector.broadcast %2 : i32 to vector<8x128xi32>
    %15 = arith.addi %4, %14 : vector<8x128xi32>
    %16 = arith.select %13, %15, %4 : vector<8x128xi1>, vector<8x128xi32>
    %c0_i32_3 = arith.constant 0 : i32
    %17 = vector.broadcast %c0_i32_3 : i32 to vector<8x128xi32>
    %18 = arith.cmpi eq, %16, %17 : vector<8x128xi32>
    %c15_i32 = arith.constant 15 : i32
    %19 = vector.broadcast %c15_i32 : i32 to vector<8x128xi32>
    %20 = arith.cmpi eq, %16, %19 : vector<8x128xi32>
    %21 = tpu.iota {dimensions = array<i32: 1>} : vector<8x128xi32>
    %c8_i32 = arith.constant 8 : i32
    %c0_i32_4 = arith.constant 0 : i32
    %22 = arith.cmpi eq, %c8_i32, %c0_i32_4 : i32
    %c1_i32_5 = arith.constant 1 : i32
    %23 = arith.select %22, %c1_i32_5, %c8_i32 : i32
    %24 = vector.broadcast %23 : i32 to vector<8x128xi32>
    %25 = arith.remsi %21, %24 : vector<8x128xi32>
    %c0_i32_6 = arith.constant 0 : i32
    %26 = vector.broadcast %c0_i32_6 : i32 to vector<8x128xi32>
    %27 = arith.cmpi ne, %25, %26 : vector<8x128xi32>
    %c0_i32_7 = arith.constant 0 : i32
    %28 = vector.broadcast %c0_i32_7 : i32 to vector<8x128xi32>
    %29 = arith.cmpi slt, %25, %28 : vector<8x128xi32>
    %c0_i32_8 = arith.constant 0 : i32
    %30 = arith.cmpi slt, %23, %c0_i32_8 : i32
    %31 = vector.broadcast %30 : i1 to vector<8x128xi1>
    %32 = vector.broadcast %31 : vector<8x128xi1> to vector<8x128xi1>
    %33 = arith.xori %29, %32 : vector<8x128xi1>
    %34 = arith.andi %33, %27 : vector<8x128xi1>
    %35 = vector.broadcast %23 : i32 to vector<8x128xi32>
    %36 = arith.addi %25, %35 : vector<8x128xi32>
    %37 = arith.select %34, %36, %25 : vector<8x128xi1>, vector<8x128xi32>
    %c0_i32_9 = arith.constant 0 : i32
    %38 = vector.broadcast %c0_i32_9 : i32 to vector<8x128xi32>
    %39 = arith.cmpi eq, %37, %38 : vector<8x128xi32>
    %c7_i32 = arith.constant 7 : i32
    %40 = vector.broadcast %c7_i32 : i32 to vector<8x128xi32>
    %41 = arith.cmpi eq, %37, %40 : vector<8x128xi32>
    %c0 = arith.constant 0 : index
    %c0_10 = arith.constant 0 : index
    %42 = vector.load %arg1[%c0, %c0_10] : memref<8x128xf32, #tpu.memory_space<vmem>>, vector<8x128xf32>
    %c0_11 = arith.constant 0 : index
    %c0_12 = arith.constant 0 : index
    %c0_13 = arith.constant 0 : index
    %c0_14 = arith.constant 0 : index
    %43 = vector.load %arg2[%c0_11, %c0_12, %c0_13, %c0_14] : memref<6x2x8x1xf32, #tpu.memory_space<vmem>>, vector<1x1x8x1xf32>
    %44 = vector.shape_cast %43 : vector<1x1x8x1xf32> to vector<8x1xf32>
    %45 = vector.broadcast %44 : vector<8x1xf32> to vector<8x128xf32>
    %46 = arith.mulf %42, %45 : vector<8x128xf32>
    %c0_15 = arith.constant 0 : index
    %c0_16 = arith.constant 0 : index
    %c0_17 = arith.constant 0 : index
    %c0_18 = arith.constant 0 : index
    %47 = vector.load %arg3[%c0_15, %c0_16, %c0_17, %c0_18] : memref<6x2x8x1xf32, #tpu.memory_space<vmem>>, vector<1x1x8x1xf32>
    %48 = vector.shape_cast %47 : vector<1x1x8x1xf32> to vector<8x1xf32>
    %49 = vector.broadcast %48 : vector<8x1xf32> to vector<8x128xf32>
    %50 = arith.addf %46, %49 : vector<8x128xf32>
    %cst = arith.constant 0.000000e+00 : f32
    %51 = vector.broadcast %cst : f32 to vector<8x128xf32>
    %52 = arith.maximumf %50, %51 : vector<8x128xf32>
    %c1_i32_19 = arith.constant 1 : i32
    %53 = tpu.dynamic_rotate %52 by %c1_i32_19 dim 1 : vector<8x128xf32>, i32 -> vector<8x128xf32>
    %cst_20 = arith.constant 0.000000e+00 : f32
    %54 = vector.broadcast %cst_20 : f32 to vector<8x128xf32>
    %55 = arith.select %18, %54, %53 : vector<8x128xi1>, vector<8x128xf32>
    %c127_i32 = arith.constant 127 : i32
    %56 = tpu.dynamic_rotate %52 by %c127_i32 dim 1 : vector<8x128xf32>, i32 -> vector<8x128xf32>
    %cst_21 = arith.constant 0.000000e+00 : f32
    %57 = vector.broadcast %cst_21 : f32 to vector<8x128xf32>
    %58 = arith.select %20, %57, %56 : vector<8x128xi1>, vector<8x128xf32>
    %c0_22 = arith.constant 0 : index
    %c0_23 = arith.constant 0 : index
    %c0_24 = arith.constant 0 : index
    %c0_25 = arith.constant 0 : index
    %c0_26 = arith.constant 0 : index
    %59 = vector.load %arg4[%c0_22, %c0_23, %c0_24, %c0_25, %c0_26] : memref<6x2x3x8x8xf32, #tpu.memory_space<vmem>>, vector<1x1x1x8x8xf32>
    %60 = vector.shape_cast %59 : vector<1x1x1x8x8xf32> to vector<8x8xf32>
    %cst_27 = arith.constant dense<0.000000e+00> : vector<8x128xf32>
    %61 = tpu.matmul %60, %55, %cst_27 {dimension_numbers = #tpu.dot_dimension_numbers<[1], [0], [0], [1], [0, 0, 1, 1], [], []>} : vector<8x8xf32>, vector<8x128xf32>, vector<8x128xf32> -> vector<8x128xf32>
    %c0_28 = arith.constant 0 : index
    %c0_29 = arith.constant 0 : index
    %c1 = arith.constant 1 : index
    %c0_30 = arith.constant 0 : index
    %c0_31 = arith.constant 0 : index
    %62 = vector.load %arg4[%c0_28, %c0_29, %c1, %c0_30, %c0_31] : memref<6x2x3x8x8xf32, #tpu.memory_space<vmem>>, vector<1x1x1x8x8xf32>
    %63 = vector.shape_cast %62 : vector<1x1x1x8x8xf32> to vector<8x8xf32>
    %cst_32 = arith.constant dense<0.000000e+00> : vector<8x128xf32>
    %64 = tpu.matmul %63, %52, %cst_32 {dimension_numbers = #tpu.dot_dimension_numbers<[1], [0], [0], [1], [0, 0, 1, 1], [], []>} : vector<8x8xf32>, vector<8x128xf32>, vector<8x128xf32> -> vector<8x128xf32>
    %65 = arith.addf %61, %64 : vector<8x128xf32>
    %c0_33 = arith.constant 0 : index
    %c0_34 = arith.constant 0 : index
    %c2 = arith.constant 2 : index
    %c0_35 = arith.constant 0 : index
    %c0_36 = arith.constant 0 : index
    %66 = vector.load %arg4[%c0_33, %c0_34, %c2, %c0_35, %c0_36] : memref<6x2x3x8x8xf32, #tpu.memory_space<vmem>>, vector<1x1x1x8x8xf32>
    %67 = vector.shape_cast %66 : vector<1x1x1x8x8xf32> to vector<8x8xf32>
    %cst_37 = arith.constant dense<0.000000e+00> : vector<8x128xf32>
    %68 = tpu.matmul %67, %58, %cst_37 {dimension_numbers = #tpu.dot_dimension_numbers<[1], [0], [0], [1], [0, 0, 1, 1], [], []>} : vector<8x8xf32>, vector<8x128xf32>, vector<8x128xf32> -> vector<8x128xf32>
    %69 = arith.addf %65, %68 : vector<8x128xf32>
    %c0_38 = arith.constant 0 : index
    %c1_39 = arith.constant 1 : index
    %c0_40 = arith.constant 0 : index
    %c0_41 = arith.constant 0 : index
    %70 = vector.load %arg2[%c0_38, %c1_39, %c0_40, %c0_41] : memref<6x2x8x1xf32, #tpu.memory_space<vmem>>, vector<1x1x8x1xf32>
    %71 = vector.shape_cast %70 : vector<1x1x8x1xf32> to vector<8x1xf32>
    %72 = vector.broadcast %71 : vector<8x1xf32> to vector<8x128xf32>
    %73 = arith.mulf %69, %72 : vector<8x128xf32>
    %c0_42 = arith.constant 0 : index
    %c1_43 = arith.constant 1 : index
    %c0_44 = arith.constant 0 : index
    %c0_45 = arith.constant 0 : index
    %74 = vector.load %arg3[%c0_42, %c1_43, %c0_44, %c0_45] : memref<6x2x8x1xf32, #tpu.memory_space<vmem>>, vector<1x1x8x1xf32>
    %75 = vector.shape_cast %74 : vector<1x1x8x1xf32> to vector<8x1xf32>
    %76 = vector.broadcast %75 : vector<8x1xf32> to vector<8x128xf32>
    %77 = arith.addf %73, %76 : vector<8x128xf32>
    %cst_46 = arith.constant 0.000000e+00 : f32
    %78 = vector.broadcast %cst_46 : f32 to vector<8x128xf32>
    %79 = arith.maximumf %77, %78 : vector<8x128xf32>
    %c1_i32_47 = arith.constant 1 : i32
    %80 = tpu.dynamic_rotate %79 by %c1_i32_47 dim 1 : vector<8x128xf32>, i32 -> vector<8x128xf32>
    %cst_48 = arith.constant 0.000000e+00 : f32
    %81 = vector.broadcast %cst_48 : f32 to vector<8x128xf32>
    %82 = arith.select %18, %81, %80 : vector<8x128xi1>, vector<8x128xf32>
    %c127_i32_49 = arith.constant 127 : i32
    %83 = tpu.dynamic_rotate %79 by %c127_i32_49 dim 1 : vector<8x128xf32>, i32 -> vector<8x128xf32>
    %cst_50 = arith.constant 0.000000e+00 : f32
    %84 = vector.broadcast %cst_50 : f32 to vector<8x128xf32>
    %85 = arith.select %20, %84, %83 : vector<8x128xi1>, vector<8x128xf32>
    %c0_51 = arith.constant 0 : index
    %c1_52 = arith.constant 1 : index
    %c0_53 = arith.constant 0 : index
    %c0_54 = arith.constant 0 : index
    %c0_55 = arith.constant 0 : index
    %86 = vector.load %arg4[%c0_51, %c1_52, %c0_53, %c0_54, %c0_55] : memref<6x2x3x8x8xf32, #tpu.memory_space<vmem>>, vector<1x1x1x8x8xf32>
    %87 = vector.shape_cast %86 : vector<1x1x1x8x8xf32> to vector<8x8xf32>
    %cst_56 = arith.constant dense<0.000000e+00> : vector<8x128xf32>
    %88 = tpu.matmul %87, %82, %cst_56 {dimension_numbers = #tpu.dot_dimension_numbers<[1], [0], [0], [1], [0, 0, 1, 1], [], []>} : vector<8x8xf32>, vector<8x128xf32>, vector<8x128xf32> -> vector<8x128xf32>
    %c0_57 = arith.constant 0 : index
    %c1_58 = arith.constant 1 : index
    %c1_59 = arith.constant 1 : index
    %c0_60 = arith.constant 0 : index
    %c0_61 = arith.constant 0 : index
    %89 = vector.load %arg4[%c0_57, %c1_58, %c1_59, %c0_60, %c0_61] : memref<6x2x3x8x8xf32, #tpu.memory_space<vmem>>, vector<1x1x1x8x8xf32>
    %90 = vector.shape_cast %89 : vector<1x1x1x8x8xf32> to vector<8x8xf32>
    %cst_62 = arith.constant dense<0.000000e+00> : vector<8x128xf32>
    %91 = tpu.matmul %90, %79, %cst_62 {dimension_numbers = #tpu.dot_dimension_numbers<[1], [0], [0], [1], [0, 0, 1, 1], [], []>} : vector<8x8xf32>, vector<8x128xf32>, vector<8x128xf32> -> vector<8x128xf32>
    %92 = arith.addf %88, %91 : vector<8x128xf32>
    %c0_63 = arith.constant 0 : index
    %c1_64 = arith.constant 1 : index
    %c2_65 = arith.constant 2 : index
    %c0_66 = arith.constant 0 : index
    %c0_67 = arith.constant 0 : index
    %93 = vector.load %arg4[%c0_63, %c1_64, %c2_65, %c0_66, %c0_67] : memref<6x2x3x8x8xf32, #tpu.memory_space<vmem>>, vector<1x1x1x8x8xf32>
    %94 = vector.shape_cast %93 : vector<1x1x1x8x8xf32> to vector<8x8xf32>
    %cst_68 = arith.constant dense<0.000000e+00> : vector<8x128xf32>
    %95 = tpu.matmul %94, %85, %cst_68 {dimension_numbers = #tpu.dot_dimension_numbers<[1], [0], [0], [1], [0, 0, 1, 1], [], []>} : vector<8x8xf32>, vector<8x128xf32>, vector<8x128xf32> -> vector<8x128xf32>
    %96 = arith.addf %92, %95 : vector<8x128xf32>
    %c0_69 = arith.constant 0 : index
    %c0_70 = arith.constant 0 : index
    %c0_71 = arith.constant 0 : index
    %97 = vector.load %arg5[%c0_69, %c0_70, %c0_71] : memref<6x8x8xf32, #tpu.memory_space<vmem>>, vector<1x8x8xf32>
    %98 = vector.shape_cast %97 : vector<1x8x8xf32> to vector<8x8xf32>
    %cst_72 = arith.constant dense<0.000000e+00> : vector<8x128xf32>
    %99 = tpu.matmul %98, %42, %cst_72 {dimension_numbers = #tpu.dot_dimension_numbers<[1], [0], [0], [1], [0, 0, 1, 1], [], []>} : vector<8x8xf32>, vector<8x128xf32>, vector<8x128xf32> -> vector<8x128xf32>
    %100 = arith.addf %96, %99 : vector<8x128xf32>
    %c1_73 = arith.constant 1 : index
    %c0_74 = arith.constant 0 : index
    %c0_75 = arith.constant 0 : index
    %c0_76 = arith.constant 0 : index
    %101 = vector.load %arg2[%c1_73, %c0_74, %c0_75, %c0_76] : memref<6x2x8x1xf32, #tpu.memory_space<vmem>>, vector<1x1x8x1xf32>
    %102 = vector.shape_cast %101 : vector<1x1x8x1xf32> to vector<8x1xf32>
    %103 = vector.broadcast %102 : vector<8x1xf32> to vector<8x128xf32>
    %104 = arith.mulf %100, %103 : vector<8x128xf32>
    %c1_77 = arith.constant 1 : index
    %c0_78 = arith.constant 0 : index
    %c0_79 = arith.constant 0 : index
    %c0_80 = arith.constant 0 : index
    %105 = vector.load %arg3[%c1_77, %c0_78, %c0_79, %c0_80] : memref<6x2x8x1xf32, #tpu.memory_space<vmem>>, vector<1x1x8x1xf32>
    %106 = vector.shape_cast %105 : vector<1x1x8x1xf32> to vector<8x1xf32>
    %107 = vector.broadcast %106 : vector<8x1xf32> to vector<8x128xf32>
    %108 = arith.addf %104, %107 : vector<8x128xf32>
    %cst_81 = arith.constant 0.000000e+00 : f32
    %109 = vector.broadcast %cst_81 : f32 to vector<8x128xf32>
    %110 = arith.maximumf %108, %109 : vector<8x128xf32>
    %c1_i32_82 = arith.constant 1 : i32
    %111 = tpu.dynamic_rotate %110 by %c1_i32_82 dim 1 : vector<8x128xf32>, i32 -> vector<8x128xf32>
    %cst_83 = arith.constant 0.000000e+00 : f32
    %112 = vector.broadcast %cst_83 : f32 to vector<8x128xf32>
    %113 = arith.select %18, %112, %111 : vector<8x128xi1>, vector<8x128xf32>
    %c127_i32_84 = arith.constant 127 : i32
    %114 = tpu.dynamic_rotate %110 by %c127_i32_84 dim 1 : vector<8x128xf32>, i32 -> vector<8x128xf32>
    %cst_85 = arith.constant 0.000000e+00 : f32
    %115 = vector.broadcast %cst_85 : f32 to vector<8x128xf32>
    %116 = arith.select %20, %115, %114 : vector<8x128xi1>, vector<8x128xf32>
    %c1_86 = arith.constant 1 : index
    %c0_87 = arith.constant 0 : index
    %c0_88 = arith.constant 0 : index
    %c0_89 = arith.constant 0 : index
    %c0_90 = arith.constant 0 : index
    %117 = vector.load %arg4[%c1_86, %c0_87, %c0_88, %c0_89, %c0_90] : memref<6x2x3x8x8xf32, #tpu.memory_space<vmem>>, vector<1x1x1x8x8xf32>
    %118 = vector.shape_cast %117 : vector<1x1x1x8x8xf32> to vector<8x8xf32>
    %cst_91 = arith.constant dense<0.000000e+00> : vector<8x128xf32>
    %119 = tpu.matmul %118, %113, %cst_91 {dimension_numbers = #tpu.dot_dimension_numbers<[1], [0], [0], [1], [0, 0, 1, 1], [], []>} : vector<8x8xf32>, vector<8x128xf32>, vector<8x128xf32> -> vector<8x128xf32>
    %c1_92 = arith.constant 1 : index
    %c0_93 = arith.constant 0 : index
    %c1_94 = arith.constant 1 : index
    %c0_95 = arith.constant 0 : index
    %c0_96 = arith.constant 0 : index
    %120 = vector.load %arg4[%c1_92, %c0_93, %c1_94, %c0_95, %c0_96] : memref<6x2x3x8x8xf32, #tpu.memory_space<vmem>>, vector<1x1x1x8x8xf32>
    %121 = vector.shape_cast %120 : vector<1x1x1x8x8xf32> to vector<8x8xf32>
    %cst_97 = arith.constant dense<0.000000e+00> : vector<8x128xf32>
    %122 = tpu.matmul %121, %110, %cst_97 {dimension_numbers = #tpu.dot_dimension_numbers<[1], [0], [0], [1], [0, 0, 1, 1], [], []>} : vector<8x8xf32>, vector<8x128xf32>, vector<8x128xf32> -> vector<8x128xf32>
    %123 = arith.addf %119, %122 : vector<8x128xf32>
    %c1_98 = arith.constant 1 : index
    %c0_99 = arith.constant 0 : index
    %c2_100 = arith.constant 2 : index
    %c0_101 = arith.constant 0 : index
    %c0_102 = arith.constant 0 : index
    %124 = vector.load %arg4[%c1_98, %c0_99, %c2_100, %c0_101, %c0_102] : memref<6x2x3x8x8xf32, #tpu.memory_space<vmem>>, vector<1x1x1x8x8xf32>
    %125 = vector.shape_cast %124 : vector<1x1x1x8x8xf32> to vector<8x8xf32>
    %cst_103 = arith.constant dense<0.000000e+00> : vector<8x128xf32>
    %126 = tpu.matmul %125, %116, %cst_103 {dimension_numbers = #tpu.dot_dimension_numbers<[1], [0], [0], [1], [0, 0, 1, 1], [], []>} : vector<8x8xf32>, vector<8x128xf32>, vector<8x128xf32> -> vector<8x128xf32>
    %127 = arith.addf %123, %126 : vector<8x128xf32>
    %c1_104 = arith.constant 1 : index
    %c1_105 = arith.constant 1 : index
    %c0_106 = arith.constant 0 : index
    %c0_107 = arith.constant 0 : index
    %128 = vector.load %arg2[%c1_104, %c1_105, %c0_106, %c0_107] : memref<6x2x8x1xf32, #tpu.memory_space<vmem>>, vector<1x1x8x1xf32>
    %129 = vector.shape_cast %128 : vector<1x1x8x1xf32> to vector<8x1xf32>
    %130 = vector.broadcast %129 : vector<8x1xf32> to vector<8x128xf32>
    %131 = arith.mulf %127, %130 : vector<8x128xf32>
    %c1_108 = arith.constant 1 : index
    %c1_109 = arith.constant 1 : index
    %c0_110 = arith.constant 0 : index
    %c0_111 = arith.constant 0 : index
    %132 = vector.load %arg3[%c1_108, %c1_109, %c0_110, %c0_111] : memref<6x2x8x1xf32, #tpu.memory_space<vmem>>, vector<1x1x8x1xf32>
    %133 = vector.shape_cast %132 : vector<1x1x8x1xf32> to vector<8x1xf32>
    %134 = vector.broadcast %133 : vector<8x1xf32> to vector<8x128xf32>
    %135 = arith.addf %131, %134 : vector<8x128xf32>
    %cst_112 = arith.constant 0.000000e+00 : f32
    %136 = vector.broadcast %cst_112 : f32 to vector<8x128xf32>
    %137 = arith.maximumf %135, %136 : vector<8x128xf32>
    %c1_i32_113 = arith.constant 1 : i32
    %138 = tpu.dynamic_rotate %137 by %c1_i32_113 dim 1 : vector<8x128xf32>, i32 -> vector<8x128xf32>
    %cst_114 = arith.constant 0.000000e+00 : f32
    %139 = vector.broadcast %cst_114 : f32 to vector<8x128xf32>
    %140 = arith.select %18, %139, %138 : vector<8x128xi1>, vector<8x128xf32>
    %c127_i32_115 = arith.constant 127 : i32
    %141 = tpu.dynamic_rotate %137 by %c127_i32_115 dim 1 : vector<8x128xf32>, i32 -> vector<8x128xf32>
    %cst_116 = arith.constant 0.000000e+00 : f32
    %142 = vector.broadcast %cst_116 : f32 to vector<8x128xf32>
    %143 = arith.select %20, %142, %141 : vector<8x128xi1>, vector<8x128xf32>
    %c1_117 = arith.constant 1 : index
    %c1_118 = arith.constant 1 : index
    %c0_119 = arith.constant 0 : index
    %c0_120 = arith.constant 0 : index
    %c0_121 = arith.constant 0 : index
    %144 = vector.load %arg4[%c1_117, %c1_118, %c0_119, %c0_120, %c0_121] : memref<6x2x3x8x8xf32, #tpu.memory_space<vmem>>, vector<1x1x1x8x8xf32>
    %145 = vector.shape_cast %144 : vector<1x1x1x8x8xf32> to vector<8x8xf32>
    %cst_122 = arith.constant dense<0.000000e+00> : vector<8x128xf32>
    %146 = tpu.matmul %145, %140, %cst_122 {dimension_numbers = #tpu.dot_dimension_numbers<[1], [0], [0], [1], [0, 0, 1, 1], [], []>} : vector<8x8xf32>, vector<8x128xf32>, vector<8x128xf32> -> vector<8x128xf32>
    %c1_123 = arith.constant 1 : index
    %c1_124 = arith.constant 1 : index
    %c1_125 = arith.constant 1 : index
    %c0_126 = arith.constant 0 : index
    %c0_127 = arith.constant 0 : index
    %147 = vector.load %arg4[%c1_123, %c1_124, %c1_125, %c0_126, %c0_127] : memref<6x2x3x8x8xf32, #tpu.memory_space<vmem>>, vector<1x1x1x8x8xf32>
    %148 = vector.shape_cast %147 : vector<1x1x1x8x8xf32> to vector<8x8xf32>
    %cst_128 = arith.constant dense<0.000000e+00> : vector<8x128xf32>
    %149 = tpu.matmul %148, %137, %cst_128 {dimension_numbers = #tpu.dot_dimension_numbers<[1], [0], [0], [1], [0, 0, 1, 1], [], []>} : vector<8x8xf32>, vector<8x128xf32>, vector<8x128xf32> -> vector<8x128xf32>
    %150 = arith.addf %146, %149 : vector<8x128xf32>
    %c1_129 = arith.constant 1 : index
    %c1_130 = arith.constant 1 : index
    %c2_131 = arith.constant 2 : index
    %c0_132 = arith.constant 0 : index
    %c0_133 = arith.constant 0 : index
    %151 = vector.load %arg4[%c1_129, %c1_130, %c2_131, %c0_132, %c0_133] : memref<6x2x3x8x8xf32, #tpu.memory_space<vmem>>, vector<1x1x1x8x8xf32>
    %152 = vector.shape_cast %151 : vector<1x1x1x8x8xf32> to vector<8x8xf32>
    %cst_134 = arith.constant dense<0.000000e+00> : vector<8x128xf32>
    %153 = tpu.matmul %152, %143, %cst_134 {dimension_numbers = #tpu.dot_dimension_numbers<[1], [0], [0], [1], [0, 0, 1, 1], [], []>} : vector<8x8xf32>, vector<8x128xf32>, vector<8x128xf32> -> vector<8x128xf32>
    %154 = arith.addf %150, %153 : vector<8x128xf32>
    %c1_135 = arith.constant 1 : index
    %c0_136 = arith.constant 0 : index
    %c0_137 = arith.constant 0 : index
    %155 = vector.load %arg5[%c1_135, %c0_136, %c0_137] : memref<6x8x8xf32, #tpu.memory_space<vmem>>, vector<1x8x8xf32>
    %156 = vector.shape_cast %155 : vector<1x8x8xf32> to vector<8x8xf32>
    %cst_138 = arith.constant dense<0.000000e+00> : vector<8x128xf32>
    %157 = tpu.matmul %156, %100, %cst_138 {dimension_numbers = #tpu.dot_dimension_numbers<[1], [0], [0], [1], [0, 0, 1, 1], [], []>} : vector<8x8xf32>, vector<8x128xf32>, vector<8x128xf32> -> vector<8x128xf32>
    %158 = arith.addf %154, %157 : vector<8x128xf32>
    %c2_139 = arith.constant 2 : index
    %c0_140 = arith.constant 0 : index
    %c0_141 = arith.constant 0 : index
    %c0_142 = arith.constant 0 : index
    %159 = vector.load %arg2[%c2_139, %c0_140, %c0_141, %c0_142] : memref<6x2x8x1xf32, #tpu.memory_space<vmem>>, vector<1x1x8x1xf32>
    %160 = vector.shape_cast %159 : vector<1x1x8x1xf32> to vector<8x1xf32>
    %161 = vector.broadcast %160 : vector<8x1xf32> to vector<8x128xf32>
    %162 = arith.mulf %158, %161 : vector<8x128xf32>
    %c2_143 = arith.constant 2 : index
    %c0_144 = arith.constant 0 : index
    %c0_145 = arith.constant 0 : index
    %c0_146 = arith.constant 0 : index
    %163 = vector.load %arg3[%c2_143, %c0_144, %c0_145, %c0_146] : memref<6x2x8x1xf32, #tpu.memory_space<vmem>>, vector<1x1x8x1xf32>
    %164 = vector.shape_cast %163 : vector<1x1x8x1xf32> to vector<8x1xf32>
    %165 = vector.broadcast %164 : vector<8x1xf32> to vector<8x128xf32>
    %166 = arith.addf %162, %165 : vector<8x128xf32>
    %cst_147 = arith.constant 0.000000e+00 : f32
    %167 = vector.broadcast %cst_147 : f32 to vector<8x128xf32>
    %168 = arith.maximumf %166, %167 : vector<8x128xf32>
    %c1_i32_148 = arith.constant 1 : i32
    %169 = tpu.dynamic_rotate %168 by %c1_i32_148 dim 1 : vector<8x128xf32>, i32 -> vector<8x128xf32>
    %cst_149 = arith.constant 0.000000e+00 : f32
    %170 = vector.broadcast %cst_149 : f32 to vector<8x128xf32>
    %171 = arith.select %18, %170, %169 : vector<8x128xi1>, vector<8x128xf32>
    %c127_i32_150 = arith.constant 127 : i32
    %172 = tpu.dynamic_rotate %168 by %c127_i32_150 dim 1 : vector<8x128xf32>, i32 -> vector<8x128xf32>
    %cst_151 = arith.constant 0.000000e+00 : f32
    %173 = vector.broadcast %cst_151 : f32 to vector<8x128xf32>
    %174 = arith.select %20, %173, %172 : vector<8x128xi1>, vector<8x128xf32>
    %c2_152 = arith.constant 2 : index
    %c0_153 = arith.constant 0 : index
    %c0_154 = arith.constant 0 : index
    %c0_155 = arith.constant 0 : index
    %c0_156 = arith.constant 0 : index
    %175 = vector.load %arg4[%c2_152, %c0_153, %c0_154, %c0_155, %c0_156] : memref<6x2x3x8x8xf32, #tpu.memory_space<vmem>>, vector<1x1x1x8x8xf32>
    %176 = vector.shape_cast %175 : vector<1x1x1x8x8xf32> to vector<8x8xf32>
    %cst_157 = arith.constant dense<0.000000e+00> : vector<8x128xf32>
    %177 = tpu.matmul %176, %171, %cst_157 {dimension_numbers = #tpu.dot_dimension_numbers<[1], [0], [0], [1], [0, 0, 1, 1], [], []>} : vector<8x8xf32>, vector<8x128xf32>, vector<8x128xf32> -> vector<8x128xf32>
    %c2_158 = arith.constant 2 : index
    %c0_159 = arith.constant 0 : index
    %c1_160 = arith.constant 1 : index
    %c0_161 = arith.constant 0 : index
    %c0_162 = arith.constant 0 : index
    %178 = vector.load %arg4[%c2_158, %c0_159, %c1_160, %c0_161, %c0_162] : memref<6x2x3x8x8xf32, #tpu.memory_space<vmem>>, vector<1x1x1x8x8xf32>
    %179 = vector.shape_cast %178 : vector<1x1x1x8x8xf32> to vector<8x8xf32>
    %cst_163 = arith.constant dense<0.000000e+00> : vector<8x128xf32>
    %180 = tpu.matmul %179, %168, %cst_163 {dimension_numbers = #tpu.dot_dimension_numbers<[1], [0], [0], [1], [0, 0, 1, 1], [], []>} : vector<8x8xf32>, vector<8x128xf32>, vector<8x128xf32> -> vector<8x128xf32>
    %181 = arith.addf %177, %180 : vector<8x128xf32>
    %c2_164 = arith.constant 2 : index
    %c0_165 = arith.constant 0 : index
    %c2_166 = arith.constant 2 : index
    %c0_167 = arith.constant 0 : index
    %c0_168 = arith.constant 0 : index
    %182 = vector.load %arg4[%c2_164, %c0_165, %c2_166, %c0_167, %c0_168] : memref<6x2x3x8x8xf32, #tpu.memory_space<vmem>>, vector<1x1x1x8x8xf32>
    %183 = vector.shape_cast %182 : vector<1x1x1x8x8xf32> to vector<8x8xf32>
    %cst_169 = arith.constant dense<0.000000e+00> : vector<8x128xf32>
    %184 = tpu.matmul %183, %174, %cst_169 {dimension_numbers = #tpu.dot_dimension_numbers<[1], [0], [0], [1], [0, 0, 1, 1], [], []>} : vector<8x8xf32>, vector<8x128xf32>, vector<8x128xf32> -> vector<8x128xf32>
    %185 = arith.addf %181, %184 : vector<8x128xf32>
    %c2_170 = arith.constant 2 : index
    %c1_171 = arith.constant 1 : index
    %c0_172 = arith.constant 0 : index
    %c0_173 = arith.constant 0 : index
    %186 = vector.load %arg2[%c2_170, %c1_171, %c0_172, %c0_173] : memref<6x2x8x1xf32, #tpu.memory_space<vmem>>, vector<1x1x8x1xf32>
    %187 = vector.shape_cast %186 : vector<1x1x8x1xf32> to vector<8x1xf32>
    %188 = vector.broadcast %187 : vector<8x1xf32> to vector<8x128xf32>
    %189 = arith.mulf %185, %188 : vector<8x128xf32>
    %c2_174 = arith.constant 2 : index
    %c1_175 = arith.constant 1 : index
    %c0_176 = arith.constant 0 : index
    %c0_177 = arith.constant 0 : index
    %190 = vector.load %arg3[%c2_174, %c1_175, %c0_176, %c0_177] : memref<6x2x8x1xf32, #tpu.memory_space<vmem>>, vector<1x1x8x1xf32>
    %191 = vector.shape_cast %190 : vector<1x1x8x1xf32> to vector<8x1xf32>
    %192 = vector.broadcast %191 : vector<8x1xf32> to vector<8x128xf32>
    %193 = arith.addf %189, %192 : vector<8x128xf32>
    %cst_178 = arith.constant 0.000000e+00 : f32
    %194 = vector.broadcast %cst_178 : f32 to vector<8x128xf32>
    %195 = arith.maximumf %193, %194 : vector<8x128xf32>
    %c1_i32_179 = arith.constant 1 : i32
    %196 = tpu.dynamic_rotate %195 by %c1_i32_179 dim 1 : vector<8x128xf32>, i32 -> vector<8x128xf32>
    %cst_180 = arith.constant 0.000000e+00 : f32
    %197 = vector.broadcast %cst_180 : f32 to vector<8x128xf32>
    %198 = arith.select %18, %197, %196 : vector<8x128xi1>, vector<8x128xf32>
    %c127_i32_181 = arith.constant 127 : i32
    %199 = tpu.dynamic_rotate %195 by %c127_i32_181 dim 1 : vector<8x128xf32>, i32 -> vector<8x128xf32>
    %cst_182 = arith.constant 0.000000e+00 : f32
    %200 = vector.broadcast %cst_182 : f32 to vector<8x128xf32>
    %201 = arith.select %20, %200, %199 : vector<8x128xi1>, vector<8x128xf32>
    %c2_183 = arith.constant 2 : index
    %c1_184 = arith.constant 1 : index
    %c0_185 = arith.constant 0 : index
    %c0_186 = arith.constant 0 : index
    %c0_187 = arith.constant 0 : index
    %202 = vector.load %arg4[%c2_183, %c1_184, %c0_185, %c0_186, %c0_187] : memref<6x2x3x8x8xf32, #tpu.memory_space<vmem>>, vector<1x1x1x8x8xf32>
    %203 = vector.shape_cast %202 : vector<1x1x1x8x8xf32> to vector<8x8xf32>
    %cst_188 = arith.constant dense<0.000000e+00> : vector<8x128xf32>
    %204 = tpu.matmul %203, %198, %cst_188 {dimension_numbers = #tpu.dot_dimension_numbers<[1], [0], [0], [1], [0, 0, 1, 1], [], []>} : vector<8x8xf32>, vector<8x128xf32>, vector<8x128xf32> -> vector<8x128xf32>
    %c2_189 = arith.constant 2 : index
    %c1_190 = arith.constant 1 : index
    %c1_191 = arith.constant 1 : index
    %c0_192 = arith.constant 0 : index
    %c0_193 = arith.constant 0 : index
    %205 = vector.load %arg4[%c2_189, %c1_190, %c1_191, %c0_192, %c0_193] : memref<6x2x3x8x8xf32, #tpu.memory_space<vmem>>, vector<1x1x1x8x8xf32>
    %206 = vector.shape_cast %205 : vector<1x1x1x8x8xf32> to vector<8x8xf32>
    %cst_194 = arith.constant dense<0.000000e+00> : vector<8x128xf32>
    %207 = tpu.matmul %206, %195, %cst_194 {dimension_numbers = #tpu.dot_dimension_numbers<[1], [0], [0], [1], [0, 0, 1, 1], [], []>} : vector<8x8xf32>, vector<8x128xf32>, vector<8x128xf32> -> vector<8x128xf32>
    %208 = arith.addf %204, %207 : vector<8x128xf32>
    %c2_195 = arith.constant 2 : index
    %c1_196 = arith.constant 1 : index
    %c2_197 = arith.constant 2 : index
    %c0_198 = arith.constant 0 : index
    %c0_199 = arith.constant 0 : index
    %209 = vector.load %arg4[%c2_195, %c1_196, %c2_197, %c0_198, %c0_199] : memref<6x2x3x8x8xf32, #tpu.memory_space<vmem>>, vector<1x1x1x8x8xf32>
    %210 = vector.shape_cast %209 : vector<1x1x1x8x8xf32> to vector<8x8xf32>
    %cst_200 = arith.constant dense<0.000000e+00> : vector<8x128xf32>
    %211 = tpu.matmul %210, %201, %cst_200 {dimension_numbers = #tpu.dot_dimension_numbers<[1], [0], [0], [1], [0, 0, 1, 1], [], []>} : vector<8x8xf32>, vector<8x128xf32>, vector<8x128xf32> -> vector<8x128xf32>
    %212 = arith.addf %208, %211 : vector<8x128xf32>
    %c2_201 = arith.constant 2 : index
    %c0_202 = arith.constant 0 : index
    %c0_203 = arith.constant 0 : index
    %213 = vector.load %arg5[%c2_201, %c0_202, %c0_203] : memref<6x8x8xf32, #tpu.memory_space<vmem>>, vector<1x8x8xf32>
    %214 = vector.shape_cast %213 : vector<1x8x8xf32> to vector<8x8xf32>
    %cst_204 = arith.constant dense<0.000000e+00> : vector<8x128xf32>
    %215 = tpu.matmul %214, %158, %cst_204 {dimension_numbers = #tpu.dot_dimension_numbers<[1], [0], [0], [1], [0, 0, 1, 1], [], []>} : vector<8x8xf32>, vector<8x128xf32>, vector<8x128xf32> -> vector<8x128xf32>
    %216 = arith.addf %212, %215 : vector<8x128xf32>
    %c1_i32_205 = arith.constant 1 : i32
    %217 = tpu.dynamic_rotate %100 by %c1_i32_205 dim 1 : vector<8x128xf32>, i32 -> vector<8x128xf32>
    %cst_206 = arith.constant 0xFF800000 : f32
    %218 = vector.broadcast %cst_206 : f32 to vector<8x128xf32>
    %219 = arith.select %18, %218, %217 : vector<8x128xi1>, vector<8x128xf32>
    %c127_i32_207 = arith.constant 127 : i32
    %220 = tpu.dynamic_rotate %100 by %c127_i32_207 dim 1 : vector<8x128xf32>, i32 -> vector<8x128xf32>
    %cst_208 = arith.constant 0xFF800000 : f32
    %221 = vector.broadcast %cst_208 : f32 to vector<8x128xf32>
    %222 = arith.select %20, %221, %220 : vector<8x128xi1>, vector<8x128xf32>
    %223 = arith.maximumf %219, %100 : vector<8x128xf32>
    %224 = arith.maximumf %223, %222 : vector<8x128xf32>
    %c0_209 = arith.constant 0 : index
    %c0_210 = arith.constant 0 : index
    %225 = vector.load %arg10[%c0_209, %c0_210] : memref<128x128xf32, #tpu.memory_space<vmem>>, vector<128x128xf32>
    %cst_211 = arith.constant dense<0.000000e+00> : vector<8x128xf32>
    %226 = tpu.matmul %224, %225, %cst_211 {dimension_numbers = #tpu.dot_dimension_numbers<[1], [0], [0], [1], [0, 0, 1, 1], [], []>} : vector<8x128xf32>, vector<128x128xf32>, vector<8x128xf32> -> vector<8x128xf32>
    %c3 = arith.constant 3 : index
    %c0_212 = arith.constant 0 : index
    %c0_213 = arith.constant 0 : index
    %c0_214 = arith.constant 0 : index
    %227 = vector.load %arg2[%c3, %c0_212, %c0_213, %c0_214] : memref<6x2x8x1xf32, #tpu.memory_space<vmem>>, vector<1x1x8x1xf32>
    %228 = vector.shape_cast %227 : vector<1x1x8x1xf32> to vector<8x1xf32>
    %229 = vector.broadcast %228 : vector<8x1xf32> to vector<8x128xf32>
    %230 = arith.mulf %226, %229 : vector<8x128xf32>
    %c3_215 = arith.constant 3 : index
    %c0_216 = arith.constant 0 : index
    %c0_217 = arith.constant 0 : index
    %c0_218 = arith.constant 0 : index
    %231 = vector.load %arg3[%c3_215, %c0_216, %c0_217, %c0_218] : memref<6x2x8x1xf32, #tpu.memory_space<vmem>>, vector<1x1x8x1xf32>
    %232 = vector.shape_cast %231 : vector<1x1x8x1xf32> to vector<8x1xf32>
    %233 = vector.broadcast %232 : vector<8x1xf32> to vector<8x128xf32>
    %234 = arith.addf %230, %233 : vector<8x128xf32>
    %cst_219 = arith.constant 0.000000e+00 : f32
    %235 = vector.broadcast %cst_219 : f32 to vector<8x128xf32>
    %236 = arith.maximumf %234, %235 : vector<8x128xf32>
    %c1_i32_220 = arith.constant 1 : i32
    %237 = tpu.dynamic_rotate %236 by %c1_i32_220 dim 1 : vector<8x128xf32>, i32 -> vector<8x128xf32>
    %cst_221 = arith.constant 0.000000e+00 : f32
    %238 = vector.broadcast %cst_221 : f32 to vector<8x128xf32>
    %239 = arith.select %39, %238, %237 : vector<8x128xi1>, vector<8x128xf32>
    %c127_i32_222 = arith.constant 127 : i32
    %240 = tpu.dynamic_rotate %236 by %c127_i32_222 dim 1 : vector<8x128xf32>, i32 -> vector<8x128xf32>
    %cst_223 = arith.constant 0.000000e+00 : f32
    %241 = vector.broadcast %cst_223 : f32 to vector<8x128xf32>
    %242 = arith.select %41, %241, %240 : vector<8x128xi1>, vector<8x128xf32>
    %c3_224 = arith.constant 3 : index
    %c0_225 = arith.constant 0 : index
    %c0_226 = arith.constant 0 : index
    %c0_227 = arith.constant 0 : index
    %c0_228 = arith.constant 0 : index
    %243 = vector.load %arg4[%c3_224, %c0_225, %c0_226, %c0_227, %c0_228] : memref<6x2x3x8x8xf32, #tpu.memory_space<vmem>>, vector<1x1x1x8x8xf32>
    %244 = vector.shape_cast %243 : vector<1x1x1x8x8xf32> to vector<8x8xf32>
    %cst_229 = arith.constant dense<0.000000e+00> : vector<8x128xf32>
    %245 = tpu.matmul %244, %239, %cst_229 {dimension_numbers = #tpu.dot_dimension_numbers<[1], [0], [0], [1], [0, 0, 1, 1], [], []>} : vector<8x8xf32>, vector<8x128xf32>, vector<8x128xf32> -> vector<8x128xf32>
    %c3_230 = arith.constant 3 : index
    %c0_231 = arith.constant 0 : index
    %c1_232 = arith.constant 1 : index
    %c0_233 = arith.constant 0 : index
    %c0_234 = arith.constant 0 : index
    %246 = vector.load %arg4[%c3_230, %c0_231, %c1_232, %c0_233, %c0_234] : memref<6x2x3x8x8xf32, #tpu.memory_space<vmem>>, vector<1x1x1x8x8xf32>
    %247 = vector.shape_cast %246 : vector<1x1x1x8x8xf32> to vector<8x8xf32>
    %cst_235 = arith.constant dense<0.000000e+00> : vector<8x128xf32>
    %248 = tpu.matmul %247, %236, %cst_235 {dimension_numbers = #tpu.dot_dimension_numbers<[1], [0], [0], [1], [0, 0, 1, 1], [], []>} : vector<8x8xf32>, vector<8x128xf32>, vector<8x128xf32> -> vector<8x128xf32>
    %249 = arith.addf %245, %248 : vector<8x128xf32>
    %c3_236 = arith.constant 3 : index
    %c0_237 = arith.constant 0 : index
    %c2_238 = arith.constant 2 : index
    %c0_239 = arith.constant 0 : index
    %c0_240 = arith.constant 0 : index
    %250 = vector.load %arg4[%c3_236, %c0_237, %c2_238, %c0_239, %c0_240] : memref<6x2x3x8x8xf32, #tpu.memory_space<vmem>>, vector<1x1x1x8x8xf32>
    %251 = vector.shape_cast %250 : vector<1x1x1x8x8xf32> to vector<8x8xf32>
    %cst_241 = arith.constant dense<0.000000e+00> : vector<8x128xf32>
    %252 = tpu.matmul %251, %242, %cst_241 {dimension_numbers = #tpu.dot_dimension_numbers<[1], [0], [0], [1], [0, 0, 1, 1], [], []>} : vector<8x8xf32>, vector<8x128xf32>, vector<8x128xf32> -> vector<8x128xf32>
    %253 = arith.addf %249, %252 : vector<8x128xf32>
    %c3_242 = arith.constant 3 : index
    %c1_243 = arith.constant 1 : index
    %c0_244 = arith.constant 0 : index
    %c0_245 = arith.constant 0 : index
    %254 = vector.load %arg2[%c3_242, %c1_243, %c0_244, %c0_245] : memref<6x2x8x1xf32, #tpu.memory_space<vmem>>, vector<1x1x8x1xf32>
    %255 = vector.shape_cast %254 : vector<1x1x8x1xf32> to vector<8x1xf32>
    %256 = vector.broadcast %255 : vector<8x1xf32> to vector<8x128xf32>
    %257 = arith.mulf %253, %256 : vector<8x128xf32>
    %c3_246 = arith.constant 3 : index
    %c1_247 = arith.constant 1 : index
    %c0_248 = arith.constant 0 : index
    %c0_249 = arith.constant 0 : index
    %258 = vector.load %arg3[%c3_246, %c1_247, %c0_248, %c0_249] : memref<6x2x8x1xf32, #tpu.memory_space<vmem>>, vector<1x1x8x1xf32>
    %259 = vector.shape_cast %258 : vector<1x1x8x1xf32> to vector<8x1xf32>
    %260 = vector.broadcast %259 : vector<8x1xf32> to vector<8x128xf32>
    %261 = arith.addf %257, %260 : vector<8x128xf32>
    %cst_250 = arith.constant 0.000000e+00 : f32
    %262 = vector.broadcast %cst_250 : f32 to vector<8x128xf32>
    %263 = arith.maximumf %261, %262 : vector<8x128xf32>
    %c1_i32_251 = arith.constant 1 : i32
    %264 = tpu.dynamic_rotate %263 by %c1_i32_251 dim 1 : vector<8x128xf32>, i32 -> vector<8x128xf32>
    %cst_252 = arith.constant 0.000000e+00 : f32
    %265 = vector.broadcast %cst_252 : f32 to vector<8x128xf32>
    %266 = arith.select %39, %265, %264 : vector<8x128xi1>, vector<8x128xf32>
    %c127_i32_253 = arith.constant 127 : i32
    %267 = tpu.dynamic_rotate %263 by %c127_i32_253 dim 1 : vector<8x128xf32>, i32 -> vector<8x128xf32>
    %cst_254 = arith.constant 0.000000e+00 : f32
    %268 = vector.broadcast %cst_254 : f32 to vector<8x128xf32>
    %269 = arith.select %41, %268, %267 : vector<8x128xi1>, vector<8x128xf32>
    %c3_255 = arith.constant 3 : index
    %c1_256 = arith.constant 1 : index
    %c0_257 = arith.constant 0 : index
    %c0_258 = arith.constant 0 : index
    %c0_259 = arith.constant 0 : index
    %270 = vector.load %arg4[%c3_255, %c1_256, %c0_257, %c0_258, %c0_259] : memref<6x2x3x8x8xf32, #tpu.memory_space<vmem>>, vector<1x1x1x8x8xf32>
    %271 = vector.shape_cast %270 : vector<1x1x1x8x8xf32> to vector<8x8xf32>
    %cst_260 = arith.constant dense<0.000000e+00> : vector<8x128xf32>
    %272 = tpu.matmul %271, %266, %cst_260 {dimension_numbers = #tpu.dot_dimension_numbers<[1], [0], [0], [1], [0, 0, 1, 1], [], []>} : vector<8x8xf32>, vector<8x128xf32>, vector<8x128xf32> -> vector<8x128xf32>
    %c3_261 = arith.constant 3 : index
    %c1_262 = arith.constant 1 : index
    %c1_263 = arith.constant 1 : index
    %c0_264 = arith.constant 0 : index
    %c0_265 = arith.constant 0 : index
    %273 = vector.load %arg4[%c3_261, %c1_262, %c1_263, %c0_264, %c0_265] : memref<6x2x3x8x8xf32, #tpu.memory_space<vmem>>, vector<1x1x1x8x8xf32>
    %274 = vector.shape_cast %273 : vector<1x1x1x8x8xf32> to vector<8x8xf32>
    %cst_266 = arith.constant dense<0.000000e+00> : vector<8x128xf32>
    %275 = tpu.matmul %274, %263, %cst_266 {dimension_numbers = #tpu.dot_dimension_numbers<[1], [0], [0], [1], [0, 0, 1, 1], [], []>} : vector<8x8xf32>, vector<8x128xf32>, vector<8x128xf32> -> vector<8x128xf32>
    %276 = arith.addf %272, %275 : vector<8x128xf32>
    %c3_267 = arith.constant 3 : index
    %c1_268 = arith.constant 1 : index
    %c2_269 = arith.constant 2 : index
    %c0_270 = arith.constant 0 : index
    %c0_271 = arith.constant 0 : index
    %277 = vector.load %arg4[%c3_267, %c1_268, %c2_269, %c0_270, %c0_271] : memref<6x2x3x8x8xf32, #tpu.memory_space<vmem>>, vector<1x1x1x8x8xf32>
    %278 = vector.shape_cast %277 : vector<1x1x1x8x8xf32> to vector<8x8xf32>
    %cst_272 = arith.constant dense<0.000000e+00> : vector<8x128xf32>
    %279 = tpu.matmul %278, %269, %cst_272 {dimension_numbers = #tpu.dot_dimension_numbers<[1], [0], [0], [1], [0, 0, 1, 1], [], []>} : vector<8x8xf32>, vector<8x128xf32>, vector<8x128xf32> -> vector<8x128xf32>
    %280 = arith.addf %276, %279 : vector<8x128xf32>
    %c3_273 = arith.constant 3 : index
    %c0_274 = arith.constant 0 : index
    %c0_275 = arith.constant 0 : index
    %281 = vector.load %arg5[%c3_273, %c0_274, %c0_275] : memref<6x8x8xf32, #tpu.memory_space<vmem>>, vector<1x8x8xf32>
    %282 = vector.shape_cast %281 : vector<1x8x8xf32> to vector<8x8xf32>
    %cst_276 = arith.constant dense<0.000000e+00> : vector<8x128xf32>
    %283 = tpu.matmul %282, %226, %cst_276 {dimension_numbers = #tpu.dot_dimension_numbers<[1], [0], [0], [1], [0, 0, 1, 1], [], []>} : vector<8x8xf32>, vector<8x128xf32>, vector<8x128xf32> -> vector<8x128xf32>
    %284 = arith.addf %280, %283 : vector<8x128xf32>
    %c4 = arith.constant 4 : index
    %c0_277 = arith.constant 0 : index
    %c0_278 = arith.constant 0 : index
    %c0_279 = arith.constant 0 : index
    %285 = vector.load %arg2[%c4, %c0_277, %c0_278, %c0_279] : memref<6x2x8x1xf32, #tpu.memory_space<vmem>>, vector<1x1x8x1xf32>
    %286 = vector.shape_cast %285 : vector<1x1x8x1xf32> to vector<8x1xf32>
    %287 = vector.broadcast %286 : vector<8x1xf32> to vector<8x128xf32>
    %288 = arith.mulf %284, %287 : vector<8x128xf32>
    %c4_280 = arith.constant 4 : index
    %c0_281 = arith.constant 0 : index
    %c0_282 = arith.constant 0 : index
    %c0_283 = arith.constant 0 : index
    %289 = vector.load %arg3[%c4_280, %c0_281, %c0_282, %c0_283] : memref<6x2x8x1xf32, #tpu.memory_space<vmem>>, vector<1x1x8x1xf32>
    %290 = vector.shape_cast %289 : vector<1x1x8x1xf32> to vector<8x1xf32>
    %291 = vector.broadcast %290 : vector<8x1xf32> to vector<8x128xf32>
    %292 = arith.addf %288, %291 : vector<8x128xf32>
    %cst_284 = arith.constant 0.000000e+00 : f32
    %293 = vector.broadcast %cst_284 : f32 to vector<8x128xf32>
    %294 = arith.maximumf %292, %293 : vector<8x128xf32>
    %c1_i32_285 = arith.constant 1 : i32
    %295 = tpu.dynamic_rotate %294 by %c1_i32_285 dim 1 : vector<8x128xf32>, i32 -> vector<8x128xf32>
    %cst_286 = arith.constant 0.000000e+00 : f32
    %296 = vector.broadcast %cst_286 : f32 to vector<8x128xf32>
    %297 = arith.select %39, %296, %295 : vector<8x128xi1>, vector<8x128xf32>
    %c127_i32_287 = arith.constant 127 : i32
    %298 = tpu.dynamic_rotate %294 by %c127_i32_287 dim 1 : vector<8x128xf32>, i32 -> vector<8x128xf32>
    %cst_288 = arith.constant 0.000000e+00 : f32
    %299 = vector.broadcast %cst_288 : f32 to vector<8x128xf32>
    %300 = arith.select %41, %299, %298 : vector<8x128xi1>, vector<8x128xf32>
    %c4_289 = arith.constant 4 : index
    %c0_290 = arith.constant 0 : index
    %c0_291 = arith.constant 0 : index
    %c0_292 = arith.constant 0 : index
    %c0_293 = arith.constant 0 : index
    %301 = vector.load %arg4[%c4_289, %c0_290, %c0_291, %c0_292, %c0_293] : memref<6x2x3x8x8xf32, #tpu.memory_space<vmem>>, vector<1x1x1x8x8xf32>
    %302 = vector.shape_cast %301 : vector<1x1x1x8x8xf32> to vector<8x8xf32>
    %cst_294 = arith.constant dense<0.000000e+00> : vector<8x128xf32>
    %303 = tpu.matmul %302, %297, %cst_294 {dimension_numbers = #tpu.dot_dimension_numbers<[1], [0], [0], [1], [0, 0, 1, 1], [], []>} : vector<8x8xf32>, vector<8x128xf32>, vector<8x128xf32> -> vector<8x128xf32>
    %c4_295 = arith.constant 4 : index
    %c0_296 = arith.constant 0 : index
    %c1_297 = arith.constant 1 : index
    %c0_298 = arith.constant 0 : index
    %c0_299 = arith.constant 0 : index
    %304 = vector.load %arg4[%c4_295, %c0_296, %c1_297, %c0_298, %c0_299] : memref<6x2x3x8x8xf32, #tpu.memory_space<vmem>>, vector<1x1x1x8x8xf32>
    %305 = vector.shape_cast %304 : vector<1x1x1x8x8xf32> to vector<8x8xf32>
    %cst_300 = arith.constant dense<0.000000e+00> : vector<8x128xf32>
    %306 = tpu.matmul %305, %294, %cst_300 {dimension_numbers = #tpu.dot_dimension_numbers<[1], [0], [0], [1], [0, 0, 1, 1], [], []>} : vector<8x8xf32>, vector<8x128xf32>, vector<8x128xf32> -> vector<8x128xf32>
    %307 = arith.addf %303, %306 : vector<8x128xf32>
    %c4_301 = arith.constant 4 : index
    %c0_302 = arith.constant 0 : index
    %c2_303 = arith.constant 2 : index
    %c0_304 = arith.constant 0 : index
    %c0_305 = arith.constant 0 : index
    %308 = vector.load %arg4[%c4_301, %c0_302, %c2_303, %c0_304, %c0_305] : memref<6x2x3x8x8xf32, #tpu.memory_space<vmem>>, vector<1x1x1x8x8xf32>
    %309 = vector.shape_cast %308 : vector<1x1x1x8x8xf32> to vector<8x8xf32>
    %cst_306 = arith.constant dense<0.000000e+00> : vector<8x128xf32>
    %310 = tpu.matmul %309, %300, %cst_306 {dimension_numbers = #tpu.dot_dimension_numbers<[1], [0], [0], [1], [0, 0, 1, 1], [], []>} : vector<8x8xf32>, vector<8x128xf32>, vector<8x128xf32> -> vector<8x128xf32>
    %311 = arith.addf %307, %310 : vector<8x128xf32>
    %c4_307 = arith.constant 4 : index
    %c1_308 = arith.constant 1 : index
    %c0_309 = arith.constant 0 : index
    %c0_310 = arith.constant 0 : index
    %312 = vector.load %arg2[%c4_307, %c1_308, %c0_309, %c0_310] : memref<6x2x8x1xf32, #tpu.memory_space<vmem>>, vector<1x1x8x1xf32>
    %313 = vector.shape_cast %312 : vector<1x1x8x1xf32> to vector<8x1xf32>
    %314 = vector.broadcast %313 : vector<8x1xf32> to vector<8x128xf32>
    %315 = arith.mulf %311, %314 : vector<8x128xf32>
    %c4_311 = arith.constant 4 : index
    %c1_312 = arith.constant 1 : index
    %c0_313 = arith.constant 0 : index
    %c0_314 = arith.constant 0 : index
    %316 = vector.load %arg3[%c4_311, %c1_312, %c0_313, %c0_314] : memref<6x2x8x1xf32, #tpu.memory_space<vmem>>, vector<1x1x8x1xf32>
    %317 = vector.shape_cast %316 : vector<1x1x8x1xf32> to vector<8x1xf32>
    %318 = vector.broadcast %317 : vector<8x1xf32> to vector<8x128xf32>
    %319 = arith.addf %315, %318 : vector<8x128xf32>
    %cst_315 = arith.constant 0.000000e+00 : f32
    %320 = vector.broadcast %cst_315 : f32 to vector<8x128xf32>
    %321 = arith.maximumf %319, %320 : vector<8x128xf32>
    %c1_i32_316 = arith.constant 1 : i32
    %322 = tpu.dynamic_rotate %321 by %c1_i32_316 dim 1 : vector<8x128xf32>, i32 -> vector<8x128xf32>
    %cst_317 = arith.constant 0.000000e+00 : f32
    %323 = vector.broadcast %cst_317 : f32 to vector<8x128xf32>
    %324 = arith.select %39, %323, %322 : vector<8x128xi1>, vector<8x128xf32>
    %c127_i32_318 = arith.constant 127 : i32
    %325 = tpu.dynamic_rotate %321 by %c127_i32_318 dim 1 : vector<8x128xf32>, i32 -> vector<8x128xf32>
    %cst_319 = arith.constant 0.000000e+00 : f32
    %326 = vector.broadcast %cst_319 : f32 to vector<8x128xf32>
    %327 = arith.select %41, %326, %325 : vector<8x128xi1>, vector<8x128xf32>
    %c4_320 = arith.constant 4 : index
    %c1_321 = arith.constant 1 : index
    %c0_322 = arith.constant 0 : index
    %c0_323 = arith.constant 0 : index
    %c0_324 = arith.constant 0 : index
    %328 = vector.load %arg4[%c4_320, %c1_321, %c0_322, %c0_323, %c0_324] : memref<6x2x3x8x8xf32, #tpu.memory_space<vmem>>, vector<1x1x1x8x8xf32>
    %329 = vector.shape_cast %328 : vector<1x1x1x8x8xf32> to vector<8x8xf32>
    %cst_325 = arith.constant dense<0.000000e+00> : vector<8x128xf32>
    %330 = tpu.matmul %329, %324, %cst_325 {dimension_numbers = #tpu.dot_dimension_numbers<[1], [0], [0], [1], [0, 0, 1, 1], [], []>} : vector<8x8xf32>, vector<8x128xf32>, vector<8x128xf32> -> vector<8x128xf32>
    %c4_326 = arith.constant 4 : index
    %c1_327 = arith.constant 1 : index
    %c1_328 = arith.constant 1 : index
    %c0_329 = arith.constant 0 : index
    %c0_330 = arith.constant 0 : index
    %331 = vector.load %arg4[%c4_326, %c1_327, %c1_328, %c0_329, %c0_330] : memref<6x2x3x8x8xf32, #tpu.memory_space<vmem>>, vector<1x1x1x8x8xf32>
    %332 = vector.shape_cast %331 : vector<1x1x1x8x8xf32> to vector<8x8xf32>
    %cst_331 = arith.constant dense<0.000000e+00> : vector<8x128xf32>
    %333 = tpu.matmul %332, %321, %cst_331 {dimension_numbers = #tpu.dot_dimension_numbers<[1], [0], [0], [1], [0, 0, 1, 1], [], []>} : vector<8x8xf32>, vector<8x128xf32>, vector<8x128xf32> -> vector<8x128xf32>
    %334 = arith.addf %330, %333 : vector<8x128xf32>
    %c4_332 = arith.constant 4 : index
    %c1_333 = arith.constant 1 : index
    %c2_334 = arith.constant 2 : index
    %c0_335 = arith.constant 0 : index
    %c0_336 = arith.constant 0 : index
    %335 = vector.load %arg4[%c4_332, %c1_333, %c2_334, %c0_335, %c0_336] : memref<6x2x3x8x8xf32, #tpu.memory_space<vmem>>, vector<1x1x1x8x8xf32>
    %336 = vector.shape_cast %335 : vector<1x1x1x8x8xf32> to vector<8x8xf32>
    %cst_337 = arith.constant dense<0.000000e+00> : vector<8x128xf32>
    %337 = tpu.matmul %336, %327, %cst_337 {dimension_numbers = #tpu.dot_dimension_numbers<[1], [0], [0], [1], [0, 0, 1, 1], [], []>} : vector<8x8xf32>, vector<8x128xf32>, vector<8x128xf32> -> vector<8x128xf32>
    %338 = arith.addf %334, %337 : vector<8x128xf32>
    %c4_338 = arith.constant 4 : index
    %c0_339 = arith.constant 0 : index
    %c0_340 = arith.constant 0 : index
    %339 = vector.load %arg5[%c4_338, %c0_339, %c0_340] : memref<6x8x8xf32, #tpu.memory_space<vmem>>, vector<1x8x8xf32>
    %340 = vector.shape_cast %339 : vector<1x8x8xf32> to vector<8x8xf32>
    %cst_341 = arith.constant dense<0.000000e+00> : vector<8x128xf32>
    %341 = tpu.matmul %340, %284, %cst_341 {dimension_numbers = #tpu.dot_dimension_numbers<[1], [0], [0], [1], [0, 0, 1, 1], [], []>} : vector<8x8xf32>, vector<8x128xf32>, vector<8x128xf32> -> vector<8x128xf32>
    %342 = arith.addf %338, %341 : vector<8x128xf32>
    %c0_342 = arith.constant 0 : index
    %c0_343 = arith.constant 0 : index
    %343 = vector.load %arg11[%c0_342, %c0_343] : memref<128x128xf32, #tpu.memory_space<vmem>>, vector<128x128xf32>
    %cst_344 = arith.constant dense<0.000000e+00> : vector<8x128xf32>
    %344 = tpu.matmul %342, %343, %cst_344 {dimension_numbers = #tpu.dot_dimension_numbers<[1], [0], [0], [1], [0, 0, 1, 1], [], []>} : vector<8x128xf32>, vector<128x128xf32>, vector<8x128xf32> -> vector<8x128xf32>
    %c0_345 = arith.constant 0 : index
    %c0_346 = arith.constant 0 : index
    %c0_347 = arith.constant 0 : index
    %345 = vector.load %arg6[%c0_345, %c0_346, %c0_347] : memref<2x8x1xf32, #tpu.memory_space<vmem>>, vector<1x8x1xf32>
    %346 = vector.shape_cast %345 : vector<1x8x1xf32> to vector<8x1xf32>
    %347 = vector.broadcast %346 : vector<8x1xf32> to vector<8x128xf32>
    %348 = arith.mulf %344, %347 : vector<8x128xf32>
    %c0_348 = arith.constant 0 : index
    %c0_349 = arith.constant 0 : index
    %c0_350 = arith.constant 0 : index
    %349 = vector.load %arg7[%c0_348, %c0_349, %c0_350] : memref<2x8x1xf32, #tpu.memory_space<vmem>>, vector<1x8x1xf32>
    %350 = vector.shape_cast %349 : vector<1x8x1xf32> to vector<8x1xf32>
    %351 = vector.broadcast %350 : vector<8x1xf32> to vector<8x128xf32>
    %352 = arith.addf %348, %351 : vector<8x128xf32>
    %cst_351 = arith.constant 0.000000e+00 : f32
    %353 = vector.broadcast %cst_351 : f32 to vector<8x128xf32>
    %354 = arith.maximumf %352, %353 : vector<8x128xf32>
    %c0_352 = arith.constant 0 : index
    %c0_353 = arith.constant 0 : index
    %c0_354 = arith.constant 0 : index
    %355 = vector.load %arg8[%c0_352, %c0_353, %c0_354] : memref<2x8x8xf32, #tpu.memory_space<vmem>>, vector<1x8x8xf32>
    %356 = vector.shape_cast %355 : vector<1x8x8xf32> to vector<8x8xf32>
    %cst_355 = arith.constant dense<0.000000e+00> : vector<8x128xf32>
    %357 = tpu.matmul %356, %354, %cst_355 {dimension_numbers = #tpu.dot_dimension_numbers<[1], [0], [0], [1], [0, 0, 1, 1], [], []>} : vector<8x8xf32>, vector<8x128xf32>, vector<8x128xf32> -> vector<8x128xf32>
    %c0_356 = arith.constant 0 : index
    %c0_357 = arith.constant 0 : index
    %c0_358 = arith.constant 0 : index
    %358 = vector.load %arg9[%c0_356, %c0_357, %c0_358] : memref<2x8x1xf32, #tpu.memory_space<vmem>>, vector<1x8x1xf32>
    %359 = vector.shape_cast %358 : vector<1x8x1xf32> to vector<8x1xf32>
    %360 = vector.broadcast %359 : vector<8x1xf32> to vector<8x128xf32>
    %361 = arith.addf %357, %360 : vector<8x128xf32>
    %c1_359 = arith.constant 1 : index
    %c0_360 = arith.constant 0 : index
    %c0_361 = arith.constant 0 : index
    %362 = vector.load %arg6[%c1_359, %c0_360, %c0_361] : memref<2x8x1xf32, #tpu.memory_space<vmem>>, vector<1x8x1xf32>
    %363 = vector.shape_cast %362 : vector<1x8x1xf32> to vector<8x1xf32>
    %364 = vector.broadcast %363 : vector<8x1xf32> to vector<8x128xf32>
    %365 = arith.mulf %361, %364 : vector<8x128xf32>
    %c1_362 = arith.constant 1 : index
    %c0_363 = arith.constant 0 : index
    %c0_364 = arith.constant 0 : index
    %366 = vector.load %arg7[%c1_362, %c0_363, %c0_364] : memref<2x8x1xf32, #tpu.memory_space<vmem>>, vector<1x8x1xf32>
    %367 = vector.shape_cast %366 : vector<1x8x1xf32> to vector<8x1xf32>
    %368 = vector.broadcast %367 : vector<8x1xf32> to vector<8x128xf32>
    %369 = arith.addf %365, %368 : vector<8x128xf32>
    %cst_365 = arith.constant 0.000000e+00 : f32
    %370 = vector.broadcast %cst_365 : f32 to vector<8x128xf32>
    %371 = arith.maximumf %369, %370 : vector<8x128xf32>
    %c1_366 = arith.constant 1 : index
    %c0_367 = arith.constant 0 : index
    %c0_368 = arith.constant 0 : index
    %372 = vector.load %arg8[%c1_366, %c0_367, %c0_368] : memref<2x8x8xf32, #tpu.memory_space<vmem>>, vector<1x8x8xf32>
    %373 = vector.shape_cast %372 : vector<1x8x8xf32> to vector<8x8xf32>
    %cst_369 = arith.constant dense<0.000000e+00> : vector<8x128xf32>
    %374 = tpu.matmul %373, %371, %cst_369 {dimension_numbers = #tpu.dot_dimension_numbers<[1], [0], [0], [1], [0, 0, 1, 1], [], []>} : vector<8x8xf32>, vector<8x128xf32>, vector<8x128xf32> -> vector<8x128xf32>
    %c1_370 = arith.constant 1 : index
    %c0_371 = arith.constant 0 : index
    %c0_372 = arith.constant 0 : index
    %375 = vector.load %arg9[%c1_370, %c0_371, %c0_372] : memref<2x8x1xf32, #tpu.memory_space<vmem>>, vector<1x8x1xf32>
    %376 = vector.shape_cast %375 : vector<1x8x1xf32> to vector<8x1xf32>
    %377 = vector.broadcast %376 : vector<8x1xf32> to vector<8x128xf32>
    %378 = arith.addf %374, %377 : vector<8x128xf32>
    %cst_373 = arith.constant 0.000000e+00 : f32
    %379 = vector.broadcast %cst_373 : f32 to vector<8x128xf32>
    %380 = arith.subf %379, %378 : vector<8x128xf32>
    %381 = math.exp %380 : vector<8x128xf32>
    %cst_374 = arith.constant 1.000000e+00 : f32
    %382 = vector.broadcast %cst_374 : f32 to vector<8x128xf32>
    %383 = arith.addf %382, %381 : vector<8x128xf32>
    %384 = tpu.reciprocal %383 : vector<8x128xf32> -> vector<8x128xf32>
    %cst_375 = arith.constant 1.000000e+00 : f32
    %385 = vector.broadcast %cst_375 : f32 to vector<8x128xf32>
    %386 = arith.addf %385, %384 : vector<8x128xf32>
    %387 = arith.mulf %386, %216 : vector<8x128xf32>
    %c5 = arith.constant 5 : index
    %c0_376 = arith.constant 0 : index
    %c0_377 = arith.constant 0 : index
    %c0_378 = arith.constant 0 : index
    %388 = vector.load %arg2[%c5, %c0_376, %c0_377, %c0_378] : memref<6x2x8x1xf32, #tpu.memory_space<vmem>>, vector<1x1x8x1xf32>
    %389 = vector.shape_cast %388 : vector<1x1x8x1xf32> to vector<8x1xf32>
    %390 = vector.broadcast %389 : vector<8x1xf32> to vector<8x128xf32>
    %391 = arith.mulf %387, %390 : vector<8x128xf32>
    %c5_379 = arith.constant 5 : index
    %c0_380 = arith.constant 0 : index
    %c0_381 = arith.constant 0 : index
    %c0_382 = arith.constant 0 : index
    %392 = vector.load %arg3[%c5_379, %c0_380, %c0_381, %c0_382] : memref<6x2x8x1xf32, #tpu.memory_space<vmem>>, vector<1x1x8x1xf32>
    %393 = vector.shape_cast %392 : vector<1x1x8x1xf32> to vector<8x1xf32>
    %394 = vector.broadcast %393 : vector<8x1xf32> to vector<8x128xf32>
    %395 = arith.addf %391, %394 : vector<8x128xf32>
    %cst_383 = arith.constant 0.000000e+00 : f32
    %396 = vector.broadcast %cst_383 : f32 to vector<8x128xf32>
    %397 = arith.maximumf %395, %396 : vector<8x128xf32>
    %c1_i32_384 = arith.constant 1 : i32
    %398 = tpu.dynamic_rotate %397 by %c1_i32_384 dim 1 : vector<8x128xf32>, i32 -> vector<8x128xf32>
    %cst_385 = arith.constant 0.000000e+00 : f32
    %399 = vector.broadcast %cst_385 : f32 to vector<8x128xf32>
    %400 = arith.select %18, %399, %398 : vector<8x128xi1>, vector<8x128xf32>
    %c127_i32_386 = arith.constant 127 : i32
    %401 = tpu.dynamic_rotate %397 by %c127_i32_386 dim 1 : vector<8x128xf32>, i32 -> vector<8x128xf32>
    %cst_387 = arith.constant 0.000000e+00 : f32
    %402 = vector.broadcast %cst_387 : f32 to vector<8x128xf32>
    %403 = arith.select %20, %402, %401 : vector<8x128xi1>, vector<8x128xf32>
    %c5_388 = arith.constant 5 : index
    %c0_389 = arith.constant 0 : index
    %c0_390 = arith.constant 0 : index
    %c0_391 = arith.constant 0 : index
    %c0_392 = arith.constant 0 : index
    %404 = vector.load %arg4[%c5_388, %c0_389, %c0_390, %c0_391, %c0_392] : memref<6x2x3x8x8xf32, #tpu.memory_space<vmem>>, vector<1x1x1x8x8xf32>
    %405 = vector.shape_cast %404 : vector<1x1x1x8x8xf32> to vector<8x8xf32>
    %cst_393 = arith.constant dense<0.000000e+00> : vector<8x128xf32>
    %406 = tpu.matmul %405, %400, %cst_393 {dimension_numbers = #tpu.dot_dimension_numbers<[1], [0], [0], [1], [0, 0, 1, 1], [], []>} : vector<8x8xf32>, vector<8x128xf32>, vector<8x128xf32> -> vector<8x128xf32>
    %c5_394 = arith.constant 5 : index
    %c0_395 = arith.constant 0 : index
    %c1_396 = arith.constant 1 : index
    %c0_397 = arith.constant 0 : index
    %c0_398 = arith.constant 0 : index
    %407 = vector.load %arg4[%c5_394, %c0_395, %c1_396, %c0_397, %c0_398] : memref<6x2x3x8x8xf32, #tpu.memory_space<vmem>>, vector<1x1x1x8x8xf32>
    %408 = vector.shape_cast %407 : vector<1x1x1x8x8xf32> to vector<8x8xf32>
    %cst_399 = arith.constant dense<0.000000e+00> : vector<8x128xf32>
    %409 = tpu.matmul %408, %397, %cst_399 {dimension_numbers = #tpu.dot_dimension_numbers<[1], [0], [0], [1], [0, 0, 1, 1], [], []>} : vector<8x8xf32>, vector<8x128xf32>, vector<8x128xf32> -> vector<8x128xf32>
    %410 = arith.addf %406, %409 : vector<8x128xf32>
    %c5_400 = arith.constant 5 : index
    %c0_401 = arith.constant 0 : index
    %c2_402 = arith.constant 2 : index
    %c0_403 = arith.constant 0 : index
    %c0_404 = arith.constant 0 : index
    %411 = vector.load %arg4[%c5_400, %c0_401, %c2_402, %c0_403, %c0_404] : memref<6x2x3x8x8xf32, #tpu.memory_space<vmem>>, vector<1x1x1x8x8xf32>
    %412 = vector.shape_cast %411 : vector<1x1x1x8x8xf32> to vector<8x8xf32>
    %cst_405 = arith.constant dense<0.000000e+00> : vector<8x128xf32>
    %413 = tpu.matmul %412, %403, %cst_405 {dimension_numbers = #tpu.dot_dimension_numbers<[1], [0], [0], [1], [0, 0, 1, 1], [], []>} : vector<8x8xf32>, vector<8x128xf32>, vector<8x128xf32> -> vector<8x128xf32>
    %414 = arith.addf %410, %413 : vector<8x128xf32>
    %c5_406 = arith.constant 5 : index
    %c1_407 = arith.constant 1 : index
    %c0_408 = arith.constant 0 : index
    %c0_409 = arith.constant 0 : index
    %415 = vector.load %arg2[%c5_406, %c1_407, %c0_408, %c0_409] : memref<6x2x8x1xf32, #tpu.memory_space<vmem>>, vector<1x1x8x1xf32>
    %416 = vector.shape_cast %415 : vector<1x1x8x1xf32> to vector<8x1xf32>
    %417 = vector.broadcast %416 : vector<8x1xf32> to vector<8x128xf32>
    %418 = arith.mulf %414, %417 : vector<8x128xf32>
    %c5_410 = arith.constant 5 : index
    %c1_411 = arith.constant 1 : index
    %c0_412 = arith.constant 0 : index
    %c0_413 = arith.constant 0 : index
    %419 = vector.load %arg3[%c5_410, %c1_411, %c0_412, %c0_413] : memref<6x2x8x1xf32, #tpu.memory_space<vmem>>, vector<1x1x8x1xf32>
    %420 = vector.shape_cast %419 : vector<1x1x8x1xf32> to vector<8x1xf32>
    %421 = vector.broadcast %420 : vector<8x1xf32> to vector<8x128xf32>
    %422 = arith.addf %418, %421 : vector<8x128xf32>
    %cst_414 = arith.constant 0.000000e+00 : f32
    %423 = vector.broadcast %cst_414 : f32 to vector<8x128xf32>
    %424 = arith.maximumf %422, %423 : vector<8x128xf32>
    %c1_i32_415 = arith.constant 1 : i32
    %425 = tpu.dynamic_rotate %424 by %c1_i32_415 dim 1 : vector<8x128xf32>, i32 -> vector<8x128xf32>
    %cst_416 = arith.constant 0.000000e+00 : f32
    %426 = vector.broadcast %cst_416 : f32 to vector<8x128xf32>
    %427 = arith.select %18, %426, %425 : vector<8x128xi1>, vector<8x128xf32>
    %c127_i32_417 = arith.constant 127 : i32
    %428 = tpu.dynamic_rotate %424 by %c127_i32_417 dim 1 : vector<8x128xf32>, i32 -> vector<8x128xf32>
    %cst_418 = arith.constant 0.000000e+00 : f32
    %429 = vector.broadcast %cst_418 : f32 to vector<8x128xf32>
    %430 = arith.select %20, %429, %428 : vector<8x128xi1>, vector<8x128xf32>
    %c5_419 = arith.constant 5 : index
    %c1_420 = arith.constant 1 : index
    %c0_421 = arith.constant 0 : index
    %c0_422 = arith.constant 0 : index
    %c0_423 = arith.constant 0 : index
    %431 = vector.load %arg4[%c5_419, %c1_420, %c0_421, %c0_422, %c0_423] : memref<6x2x3x8x8xf32, #tpu.memory_space<vmem>>, vector<1x1x1x8x8xf32>
    %432 = vector.shape_cast %431 : vector<1x1x1x8x8xf32> to vector<8x8xf32>
    %cst_424 = arith.constant dense<0.000000e+00> : vector<8x128xf32>
    %433 = tpu.matmul %432, %427, %cst_424 {dimension_numbers = #tpu.dot_dimension_numbers<[1], [0], [0], [1], [0, 0, 1, 1], [], []>} : vector<8x8xf32>, vector<8x128xf32>, vector<8x128xf32> -> vector<8x128xf32>
    %c5_425 = arith.constant 5 : index
    %c1_426 = arith.constant 1 : index
    %c1_427 = arith.constant 1 : index
    %c0_428 = arith.constant 0 : index
    %c0_429 = arith.constant 0 : index
    %434 = vector.load %arg4[%c5_425, %c1_426, %c1_427, %c0_428, %c0_429] : memref<6x2x3x8x8xf32, #tpu.memory_space<vmem>>, vector<1x1x1x8x8xf32>
    %435 = vector.shape_cast %434 : vector<1x1x1x8x8xf32> to vector<8x8xf32>
    %cst_430 = arith.constant dense<0.000000e+00> : vector<8x128xf32>
    %436 = tpu.matmul %435, %424, %cst_430 {dimension_numbers = #tpu.dot_dimension_numbers<[1], [0], [0], [1], [0, 0, 1, 1], [], []>} : vector<8x8xf32>, vector<8x128xf32>, vector<8x128xf32> -> vector<8x128xf32>
    %437 = arith.addf %433, %436 : vector<8x128xf32>
    %c5_431 = arith.constant 5 : index
    %c1_432 = arith.constant 1 : index
    %c2_433 = arith.constant 2 : index
    %c0_434 = arith.constant 0 : index
    %c0_435 = arith.constant 0 : index
    %438 = vector.load %arg4[%c5_431, %c1_432, %c2_433, %c0_434, %c0_435] : memref<6x2x3x8x8xf32, #tpu.memory_space<vmem>>, vector<1x1x1x8x8xf32>
    %439 = vector.shape_cast %438 : vector<1x1x1x8x8xf32> to vector<8x8xf32>
    %cst_436 = arith.constant dense<0.000000e+00> : vector<8x128xf32>
    %440 = tpu.matmul %439, %430, %cst_436 {dimension_numbers = #tpu.dot_dimension_numbers<[1], [0], [0], [1], [0, 0, 1, 1], [], []>} : vector<8x8xf32>, vector<8x128xf32>, vector<8x128xf32> -> vector<8x128xf32>
    %441 = arith.addf %437, %440 : vector<8x128xf32>
    %c5_437 = arith.constant 5 : index
    %c0_438 = arith.constant 0 : index
    %c0_439 = arith.constant 0 : index
    %442 = vector.load %arg5[%c5_437, %c0_438, %c0_439] : memref<6x8x8xf32, #tpu.memory_space<vmem>>, vector<1x8x8xf32>
    %443 = vector.shape_cast %442 : vector<1x8x8xf32> to vector<8x8xf32>
    %cst_440 = arith.constant dense<0.000000e+00> : vector<8x128xf32>
    %444 = tpu.matmul %443, %387, %cst_440 {dimension_numbers = #tpu.dot_dimension_numbers<[1], [0], [0], [1], [0, 0, 1, 1], [], []>} : vector<8x8xf32>, vector<8x128xf32>, vector<8x128xf32> -> vector<8x128xf32>
    %445 = arith.addf %441, %444 : vector<8x128xf32>
    %c0_441 = arith.constant 0 : index
    %c0_442 = arith.constant 0 : index
    %446 = vector.load %arg12[%c0_441, %c0_442] : memref<8x128xf32, #tpu.memory_space<vmem>>, vector<8x128xf32>
    tpu.vector_store %arg12[%c0_441, %c0_442], %445 {strides = array<i32>} : memref<8x128xf32, #tpu.memory_space<vmem>>, vector<8x128xf32>,
    return
  }
  func.func @transform_0(%arg0: i32) -> (i32, i32) {
    %c0_i32 = arith.constant 0 : i32
    %c0_i32_0 = arith.constant 0 : i32
    return %c0_i32, %arg0 : i32, i32
  }
  func.func @transform_1(%arg0: i32) -> (i32, i32, i32, i32) {
    %c0_i32 = arith.constant 0 : i32
    %c0_i32_0 = arith.constant 0 : i32
    %c0_i32_1 = arith.constant 0 : i32
    %c0_i32_2 = arith.constant 0 : i32
    %c0_i32_3 = arith.constant 0 : i32
    return %c0_i32, %c0_i32_0, %c0_i32_1, %c0_i32_2 : i32, i32, i32, i32
  }
  func.func @transform_2(%arg0: i32) -> (i32, i32, i32, i32) {
    %c0_i32 = arith.constant 0 : i32
    %c0_i32_0 = arith.constant 0 : i32
    %c0_i32_1 = arith.constant 0 : i32
    %c0_i32_2 = arith.constant 0 : i32
    %c0_i32_3 = arith.constant 0 : i32
    return %c0_i32, %c0_i32_0, %c0_i32_1, %c0_i32_2 : i32, i32, i32, i32
  }
  func.func @transform_3(%arg0: i32) -> (i32, i32, i32, i32, i32) {
    %c0_i32 = arith.constant 0 : i32
    %c0_i32_0 = arith.constant 0 : i32
    %c0_i32_1 = arith.constant 0 : i32
    %c0_i32_2 = arith.constant 0 : i32
    %c0_i32_3 = arith.constant 0 : i32
    %c0_i32_4 = arith.constant 0 : i32
    return %c0_i32, %c0_i32_0, %c0_i32_1, %c0_i32_2, %c0_i32_3 : i32, i32, i32, i32, i32
  }
  func.func @transform_4(%arg0: i32) -> (i32, i32, i32) {
    %c0_i32 = arith.constant 0 : i32
    %c0_i32_0 = arith.constant 0 : i32
    %c0_i32_1 = arith.constant 0 : i32
    %c0_i32_2 = arith.constant 0 : i32
    return %c0_i32, %c0_i32_0, %c0_i32_1 : i32, i32, i32
  }
  func.func @transform_5(%arg0: i32) -> (i32, i32, i32) {
    %c0_i32 = arith.constant 0 : i32
    %c0_i32_0 = arith.constant 0 : i32
    %c0_i32_1 = arith.constant 0 : i32
    %c0_i32_2 = arith.constant 0 : i32
    return %c0_i32, %c0_i32_0, %c0_i32_1 : i32, i32, i32
  }
  func.func @transform_6(%arg0: i32) -> (i32, i32, i32) {
    %c0_i32 = arith.constant 0 : i32
    %c0_i32_0 = arith.constant 0 : i32
    %c0_i32_1 = arith.constant 0 : i32
    %c0_i32_2 = arith.constant 0 : i32
    return %c0_i32, %c0_i32_0, %c0_i32_1 : i32, i32, i32
  }
  func.func @transform_7(%arg0: i32) -> (i32, i32, i32) {
    %c0_i32 = arith.constant 0 : i32
    %c0_i32_0 = arith.constant 0 : i32
    %c0_i32_1 = arith.constant 0 : i32
    %c0_i32_2 = arith.constant 0 : i32
    return %c0_i32, %c0_i32_0, %c0_i32_1 : i32, i32, i32
  }
  func.func @transform_8(%arg0: i32) -> (i32, i32, i32) {
    %c0_i32 = arith.constant 0 : i32
    %c0_i32_0 = arith.constant 0 : i32
    %c0_i32_1 = arith.constant 0 : i32
    %c0_i32_2 = arith.constant 0 : i32
    return %c0_i32, %c0_i32_0, %c0_i32_1 : i32, i32, i32
  }
  func.func @transform_9(%arg0: i32) -> (i32, i32) {
    %c0_i32 = arith.constant 0 : i32
    %c0_i32_0 = arith.constant 0 : i32
    %c0_i32_1 = arith.constant 0 : i32
    return %c0_i32, %c0_i32_0 : i32, i32
  }
  func.func @transform_10(%arg0: i32) -> (i32, i32) {
    %c0_i32 = arith.constant 0 : i32
    %c0_i32_0 = arith.constant 0 : i32
    %c0_i32_1 = arith.constant 0 : i32
    return %c0_i32, %c0_i32_0 : i32, i32
  }
  func.func @transform_11(%arg0: i32) -> (i32, i32) {
    %c0_i32 = arith.constant 0 : i32
    %c0_i32_0 = arith.constant 0 : i32
    return %c0_i32, %arg0 : i32, i32
  }
}

</mosaic_0001>

<bundles_post_ra>
// kernel: tpu_custom_call.1
= control target key start
LH: loop header
LB: loop body
LE: loop exit
PB: predicated region body
PF: predicated region fallthrough
CT: control target
= control target key end

     0   :  { %16 = vsyncpa [#allocation3], 0  ;;  %s5212_s0 = inlined_call_operand.hbm [shape: f32[8,128], index: 0, kind: input, shape index: {}]   ;;  %s5213_s1 = inlined_call_operand.vmem [shape: f32[6,2,8,1], index: 1, kind: input, shape index: {}]   ;;  %s5214_s2 = inlined_call_operand.vmem [shape: f32[6,2,8,1], index: 2, kind: input, shape index: {}]   ;;  %s5215_s3 = inlined_call_operand.hbm [shape: f32[6,2,3,8,8], index: 3, kind: input, shape index: {}]   ;;  %s5216_s4 = inlined_call_operand.hbm [shape: f32[6,8,8], index: 4, kind: input, shape index: {}]   ;;  %s5217_s5 = inlined_call_operand.vmem [shape: f32[2,8,1], index: 5, kind: input, shape index: {}]   ;;  %s5218_s6 = inlined_call_operand.vmem [shape: f32[2,8,1], index: 6, kind: input, shape index: {}]   ;;  %s5219_s7 = inlined_call_operand.vmem [shape: f32[2,8,8], index: 7, kind: input, shape index: {}]   ;;  %s5220_s8 = inlined_call_operand.vmem [shape: f32[2,8,1], index: 8, kind: input, shape index: {}]   ;;  %s5221_s9 = inlined_call_operand.vmem [shape: f32[128,128], index: 9, kind: input, shape index: {}]   ;;  %s5222_s10 = inlined_call_operand.vmem [shape: f32[128,128], index: 10, kind: input, shape index: {}]   ;;  %s5223_s11 = inlined_call_operand.hbm [shape: f32[8,128], index: 11, kind: output, shape index: {}]  }
   0x1   :  { %17 = vsyncpa [#allocation6], 0 }
   0x2   :  { %18 = vsyncpa [#allocation4], 0  ;;  %s4583_s17 = smov [#allocation5]  }
   0x3   :  { %s38_s18 = sshll.u32 %s4583_s17, 4  ;;  %s39_s18 = int_to_ptr.vmem [resolvable:$true] %s38_s18 }
   0x4   :  { %s4505_s19 = scalar_lea.vmem %s39_s18, 4608  ;;  %p4510_p1 = scmp.lt.s32.totalorder %s39_s18, %s39_s18 }
   0x5   :  { %p4506_p0 = scmp.ne.s32.totalorder %s39_s18, %s4505_s19  ;;  %p4511_p2 = scmp.lt.s32.totalorder %s4505_s19, %s4505_s19 }
   0x7   :  { %p4512_p3 = por %p4511_p2, %p4510_p1 }
   0x9   :  { %p4513_p4 = pnand %p4512_p3, %p4506_p0 }
   0xb   :  { %4516 = shalt.err (!%p4513_p4)
}
   0xc   :  { %s4584_s20 = smov 128   ;;  %s4585_s21 = smov 8  }
   0xd   :  { %44 = dma.hbm_to_vmem [thread:$0]  %s5215_s3, 4608, %s39_s18, [#allocation6], %s4584_s20, %s4584_s20, %s4585_s21  }
   0xe   :  { %s4586_s24 = smov [#allocation2]   ;;  %s4587_s26 = smov [#allocation7]  }
   0xf   :  { %s25_s25 = sshll.u32 %s4586_s24, 4  ;;  %s50_s27 = sshll.u32 %s4587_s26, 4  ;;  %s26_s25 = int_to_ptr.vmem [resolvable:$true] %s25_s25  ;;  %s51_s27 = int_to_ptr.vmem [resolvable:$true] %s50_s27 }
  0x10   :  { %s4525_s28 = scalar_lea.vmem %s26_s25, 128  ;;  %p4530_p6 = scmp.lt.s32.totalorder %s26_s25, %s26_s25 }
  0x11   :  { %p4526_p5 = scmp.ne.s32.totalorder %s26_s25, %s4525_s28  ;;  %p4531_p7 = scmp.lt.s32.totalorder %s4525_s28, %s4525_s28 }
  0x13   :  { %p4532_p8 = por %p4531_p7, %p4530_p6 }
  0x15   :  { %p4533_p9 = pnand %p4532_p8, %p4526_p5 }
  0x17   :  { %4536 = shalt.err (!%p4533_p9)
}
  0x18   :  { %28 = dma.hbm_to_vmem [thread:$0]  %s5212_s0, 128, %s26_s25, [#allocation3]  }
  0x19   :  { %s4545_s12 = scalar_lea.vmem %s51_s27, 768  ;;  %p4550_p11 = scmp.lt.s32.totalorder %s51_s27, %s51_s27 }
  0x1a   :  { %p4546_p10 = scmp.ne.s32.totalorder %s51_s27, %s4545_s12  ;;  %p4551_p12 = scmp.lt.s32.totalorder %s4545_s12, %s4545_s12 }
  0x1c   :  { %p4552_p13 = por %p4551_p12, %p4550_p11 }
  0x1e   :  { %p4553_p0 = pnand %p4552_p13, %p4546_p10 }
  0x20   :  { %4556 = shalt.err (!%p4553_p0)
}
  0x21   :  { %56 = dma.hbm_to_vmem [thread:$0]  %s5216_s4, 768, %s51_s27, [#allocation6], %s4584_s20, %s4584_s20, %s4585_s21  }
  0x22   :  { %4577 = dma.done.wait [#allocation3], 128  }
  0x23   :  { %4578 = vsyncadd [#allocation3], 4294967168 }
  0x24   :  { %4579 = dma.done.wait [#allocation6], 5376  }
  0x25   :  { %4580 = vsyncadd [#allocation6], 4294961920  ;;  %v4588_v0 = vmov 0   ;;  %v109_v1 = vld [vmem:[%s5213_s1] sm:$0xff]  ;;  %v4589_v3 = vmov 0.0   ;;  %v3955_v4 = vld [vmem:[%s5213_s1 + $0x8] sm:$0xff]  ;;  %v78_v13 = vlaneseq }
  0x26   :  { %4491 = vset.pattern.permute.xlu0 %v4588_v0  ;;  %4492 = vset.pattern.permute.xlu1 %v4588_v0  ;;  %v116_v2 = vld [vmem:[%s5214_s2] sm:$0xff]  ;;  %vm4590_vm0 = vmmov 0   ;;  %v132_v11 = vld [vmem:[#allocation5 + $0x8] sm:$0xff]  ;;  %vm133_vm1 = vcmask 64512   ;;  %s4591_s18 = smov 1   ;;  %s4592_s19 = smov 127  }
  0x27   :  { %112 = vperm.xlu0 %4491, %v109_v1   ;;  %4190 = vmatprep.subr.mxu0 %v4589_v3  ;;  %v4678_v6 = vld [vmem:[#allocation2] sm:$0xff]  ;;  %v3956_v12 = vld [vmem:[%s5214_s2 + $0x8] sm:$0xff]  ;;  %v4690_v14 = vand.u32 127, %v78_v13  ;;  %v281_v22 = vld [vmem:[#allocation5 + $0x10] sm:$0xff] }
  0x28   :  { %4195 = vmatprep.subr.mxu1 %v4589_v3  ;;  %4192 = vmatprep.mubr.msk.f32.mxu0 %vm4590_vm0, %v4589_v3  ;;  %v130_v18 = vld [vmem:[#allocation5] sm:$0xff]  ;;  %v3966_v38 = vld [vmem:[%s5214_s2 + $0x10] sm:$0xff]  ;;  %v380_v40 = vld [vmem:[#allocation5 + $0x18] sm:$0xff] }
  0x29   :  { %4197 = vmatprep.mubr.msk.f32.mxu1 %vm4590_vm0, %v4589_v3  ;;  %v84_v15 = vand.u32 15, %v4690_v14  ;;  %v382_v37 = vld [vmem:[#allocation5 + $0x20] sm:$0xff]  ;;  %v3965_v39 = vld [vmem:[%s5213_s1 + $0x10] sm:$0xff]  ;;  %v706_v61 = vld [vmem:[#allocation5 + $0x38] sm:$0xff] }
  0x2a   :  { %v530_v41 = vld [vmem:[#allocation5 + $0x28] sm:$0xff]  ;;  %v605_v44 = vld [vmem:[#allocation7] sm:$0xff]  ;;  %v3975_v62 = vld [vmem:[%s5214_s2 + $0x18] sm:$0xff] }
  0x2b   :  { %119 = vperm.xlu0 %4491, %v116_v2   ;;  %vm4693_vm2 = vcmp.eq.s32.totalorder %v84_v15, 0  ;;  %vm4703_vm4 = vcmp.eq.s32.totalorder %v84_v15, 15  ;;  %v3974_v63 = vld [vmem:[%s5213_s1 + $0x18] sm:$0xff]  ;;  %v854_v1 = vld [vmem:[#allocation5 + $0x40] sm:$0xff]  ;;  %v1836_v16 = vld [vmem:[%s5221_s9] sm:$0xff] }
  0x2c   :  { %vm4699_vm3 = vmneg %vm4693_vm2  ;;  %v704_v0 = vld [vmem:[#allocation5 + $0x30] sm:$0xff] }
  0x2d   :  { %vm4712_vm5 = vmneg %vm4703_vm4 }
  0x2f   :  { %360 = vperm.xlu0 %4491, %v3955_v4  }
  0xa2   :  { %v113_v5 = vpop.permute.xlu0 %112 }
  0xa3   :  { %v115_v7 = vmul.f32 %v113_v5, %v4678_v6 }
  0xa6   :  { %v120_v8 = vpop.permute.xlu0 %119 }
  0xa7   :  { %v122_v9 = vadd.f32 %v120_v8, %v115_v7 }
  0xa9   :  { %v123_v10 = vmax.f32 %v122_v9, 0.0 }
  0xaa   :  { %v361_v30 = vpop.permute.xlu0 %360 }
  0xab   :  { %124 = vrot.lane.b32.xlu1 %v123_v10, %s4591_s18  ;;  %4191 = vmatpush3.msra.mxu0 %v123_v10 }
  0xac   :  { %4193 = vmatmul.mubr.msk.f32.vlgmr.msra.gmra.mxu0 %vm133_vm1, %v132_v11  ;;  %4200 = vmatprep.subr.mxu0 %v4589_v3 }
  0xad   :  { %4202 = vmatprep.mubr.msk.f32.mxu0 %vm4590_vm0, %v4589_v3 }
  0xaf   :  { %127 = vrot.lane.b32.xlu1 %v123_v10, %s4592_s19 }
  0xb3   :  { %368 = vperm.xlu1 %4492, %v3956_v12  }
 0x11d   :  { %v125_v20 = vpop.permute.xlu1 %124 }
 0x11e   :  { %4196 = vmatpush3.msk.msra.mxu1 %vm4699_vm3, %v125_v20 }
 0x11f   :  { %4198 = vmatmul.mubr.msk.f32.vlgmr.msra.gmra.mxu1 %vm133_vm1, %v130_v18  ;;  %4205 = vmatprep.subr.mxu1 %v4589_v3 }
 0x120   :  { %4207 = vmatprep.mubr.msk.f32.mxu1 %vm4590_vm0, %v4589_v3 }
 0x121   :  { %v128_v23 = vpop.permute.xlu1 %127 }
 0x122   :  { %4201 = vmatpush3.msk.msra.mxu0 %vm4712_vm5, %v128_v23  ;;  %v955_v23 = vld [vmem:[#allocation5 + $0x50] sm:$0xff] }
 0x123   :  { %4203 = vmatmul.mubr.msk.f32.vlgmr.msra.gmra.mxu0 %vm133_vm1, %v281_v22  ;;  %4210 = vmatprep.subr.mxu0 %v4589_v3 }
 0x124   :  { %4212 = vmatprep.mubr.msk.f32.mxu0 %vm4590_vm0, %v4589_v3 }
 0x12e   :  { %v369_v33 = vpop.permute.xlu1 %368 }
 0x16c   :  { %v203_v24 = vpop.f32.mrf.mxu0 }
 0x16e   :  { %v4194_v25 = vpop.f32.mrf.mxu0 }
 0x16f   :  { %v3984_v25 = vld [vmem:[%s5213_s1 + $0x20] sm:$0xff] }
 0x1df   :  { %v276_v26 = vpop.f32.mrf.mxu1 }
 0x1e0   :  { %v277_v28 = vadd.f32 %v276_v26, %v203_v24  ;;  %v3985_v24 = vld [vmem:[%s5214_s2 + $0x20] sm:$0xff]  ;;  %v953_v26 = vld [vmem:[#allocation5 + $0x48] sm:$0xff] }
 0x1e1   :  { %v4199_v27 = vpop.f32.mrf.mxu1 }
 0x1e2   :  { %v1103_v27 = vld [vmem:[#allocation5 + $0x58] sm:$0xff] }
 0x1e3   :  { %v351_v29 = vpop.f32.mrf.mxu0 }
 0x1e4   :  { %v355_v31 = vadd.f32 %v351_v29, %v277_v28 }
 0x1e5   :  { %v4204_v32 = vpop.f32.mrf.mxu0 }
 0x1e6   :  { %v363_v34 = vmul.f32 %v361_v30, %v355_v31  ;;  %v1179_v30 = vld [vmem:[#allocation7 + $0x8] sm:$0xff] }
 0x1e8   :  { %v371_v35 = vadd.f32 %v369_v33, %v363_v34 }
 0x1ea   :  { %v372_v36 = vmax.f32 %v371_v35, 0.0 }
 0x1ec   :  { %376 = vrot.lane.b32.xlu1 %v372_v36, %s4592_s19  ;;  %373 = vrot.lane.b32.xlu0 %v372_v36, %s4591_s18 }
 0x1ed   :  { %4206 = vmatpush3.msra.mxu1 %v372_v36 }
 0x1ee   :  { %4208 = vmatmul.mubr.msk.f32.vlgmr.msra.gmra.mxu1 %vm133_vm1, %v382_v37  ;;  %4215 = vmatprep.subr.mxu1 %v4589_v3 }
 0x1ef   :  { %4217 = vmatprep.mubr.msk.f32.mxu1 %vm4590_vm0, %v4589_v3 }
 0x1f0   :  { %692 = vperm.xlu1 %4492, %v3966_v38   ;;  %684 = vperm.xlu0 %4491, %v3965_v39  }
 0x25e   :  { %v377_v42 = vpop.permute.xlu1 %376  ;;  %v374_v43 = vpop.permute.xlu0 %373 }
 0x25f   :  { %4211 = vmatpush3.msk.msra.mxu0 %vm4699_vm3, %v374_v43  ;;  %4216 = vmatpush3.msk.msra.mxu1 %vm4712_vm5, %v377_v42 }
 0x260   :  { %4213 = vmatmul.mubr.msk.f32.vlgmr.msra.gmra.mxu0 %vm133_vm1, %v380_v40  ;;  %4218 = vmatmul.mubr.msk.f32.vlgmr.msra.gmra.mxu1 %vm133_vm1, %v530_v41 }
 0x261   :  { %4220 = vmatprep.subr.mxu0 %v4589_v3  ;;  %4222 = vmatprep.mubr.msk.f32.mxu0 %vm4590_vm0, %v4589_v3 }
 0x262   :  { %4221 = vmatpush3.msra.mxu0 %v4678_v6  ;;  %4225 = vmatprep.subr.mxu1 %v4589_v3 }
 0x263   :  { %4227 = vmatprep.mubr.msk.f32.mxu1 %vm4590_vm0, %v4589_v3  ;;  %4230 = vmatprep.subr.mxu0 %v4589_v3 }
 0x264   :  { %4223 = vmatmul.mubr.msk.f32.vlgmr.msra.gmra.mxu0 %vm133_vm1, %v605_v44 }
 0x265   :  { %4232 = vmatprep.mubr.msk.f32.mxu0 %vm4590_vm0, %v4589_v3 }
 0x26b   :  { %v685_v55 = vpop.permute.xlu0 %684  ;;  %v693_v58 = vpop.permute.xlu1 %692 }
 0x2ae   :  { %v452_v45 = vpop.f32.mrf.mxu1 }
 0x2b0   :  { %v4209_v46 = vpop.f32.mrf.mxu1 }
 0x320   :  { %v525_v47 = vpop.f32.mrf.mxu0  ;;  %v600_v48 = vpop.f32.mrf.mxu1 }
 0x321   :  { %v526_v49 = vadd.f32 %v525_v47, %v452_v45  ;;  %v1280_v47 = vld [vmem:[#allocation5 + $0x68] sm:$0xff] }
 0x322   :  { %v4214_v50 = vpop.f32.mrf.mxu0  ;;  %v4219_v51 = vpop.f32.mrf.mxu1 }
 0x323   :  { %v604_v52 = vadd.f32 %v600_v48, %v526_v49  ;;  %v3994_v48 = vld [vmem:[%s5214_s2 + $0x28] sm:$0xff]  ;;  %v4003_v50 = vld [vmem:[%s5213_s1 + $0x30] sm:$0xff] }
 0x324   :  { %v675_v53 = vpop.f32.mrf.mxu0  ;;  %v3993_v49 = vld [vmem:[%s5213_s1 + $0x28] sm:$0xff] }
 0x325   :  { %v4754_v54 = vadd.f32 %v675_v53, %v604_v52  ;;  %v1278_v51 = vld [vmem:[#allocation5 + $0x60] sm:$0xff]  ;;  %v1428_v52 = vld [vmem:[#allocation5 + $0x70] sm:$0xff] }
 0x326   :  { %v4224_v56 = vpop.f32.mrf.mxu0 }
 0x327   :  { %v687_v57 = vmul.f32 %v685_v55, %v4754_v54 }
 0x329   :  { %v695_v59 = vadd.f32 %v693_v58, %v687_v57 }
 0x32b   :  { %v696_v60 = vmax.f32 %v695_v59, 0.0 }
 0x32d   :  { %700 = vrot.lane.b32.xlu1 %v696_v60, %s4592_s19  ;;  %697 = vrot.lane.b32.xlu0 %v696_v60, %s4591_s18 }
 0x32e   :  { %4226 = vmatpush3.msra.mxu1 %v696_v60 }
 0x32f   :  { %4228 = vmatmul.mubr.msk.f32.vlgmr.msra.gmra.mxu1 %vm133_vm1, %v706_v61  ;;  %4235 = vmatprep.subr.mxu1 %v4589_v3 }
 0x330   :  { %4237 = vmatprep.mubr.msk.f32.mxu1 %vm4590_vm0, %v4589_v3 }
 0x331   :  { %941 = vperm.xlu1 %4492, %v3975_v62   ;;  %933 = vperm.xlu0 %4491, %v3974_v63  }
 0x39f   :  { %v701_v2 = vpop.permute.xlu1 %700  ;;  %v698_v4 = vpop.permute.xlu0 %697 }
 0x3a0   :  { %4231 = vmatpush3.msk.msra.mxu0 %vm4699_vm3, %v698_v4  ;;  %4236 = vmatpush3.msk.msra.mxu1 %vm4712_vm5, %v701_v2 }
 0x3a1   :  { %4233 = vmatmul.mubr.msk.f32.vlgmr.msra.gmra.mxu0 %vm133_vm1, %v704_v0  ;;  %4238 = vmatmul.mubr.msk.f32.vlgmr.msra.gmra.mxu1 %vm133_vm1, %v854_v1 }
 0x3a2   :  { %4240 = vmatprep.subr.mxu0 %v4589_v3  ;;  %4242 = vmatprep.mubr.msk.f32.mxu0 %vm4590_vm0, %v4589_v3 }
 0x3a3   :  { %4245 = vmatprep.subr.mxu1 %v4589_v3  ;;  %4247 = vmatprep.mubr.msk.f32.mxu1 %vm4590_vm0, %v4589_v3 }
 0x3ac   :  { %v934_v13 = vpop.permute.xlu0 %933  ;;  %v942_v18 = vpop.permute.xlu1 %941 }
 0x3ef   :  { %v776_v5 = vpop.f32.mrf.mxu1 }
 0x3f1   :  { %v4229_v6 = vpop.f32.mrf.mxu1 }
 0x3f2   :  { %v1529_v6 = vld [vmem:[#allocation5 + $0x80] sm:$0xff] }
 0x461   :  { %v849_v7 = vpop.f32.mrf.mxu0  ;;  %v924_v8 = vpop.f32.mrf.mxu1 }
 0x462   :  { %v850_v9 = vadd.f32 %v849_v7, %v776_v5  ;;  %v4004_v7 = vld [vmem:[%s5214_s2 + $0x30] sm:$0xff] }
 0x463   :  { %v4234_v10 = vpop.f32.mrf.mxu0  ;;  %v4239_v11 = vpop.f32.mrf.mxu1 }
 0x464   :  { %v928_v12 = vadd.f32 %v924_v8, %v850_v9  ;;  %v1527_v10 = vld [vmem:[#allocation5 + $0x78] sm:$0xff]  ;;  %v1677_v11 = vld [vmem:[#allocation5 + $0x88] sm:$0xff] }
 0x466   :  { %v936_v15 = vmul.f32 %v934_v13, %v928_v12 }
 0x468   :  { %v944_v20 = vadd.f32 %v942_v18, %v936_v15  ;;  %v1851_v15 = vld [vmem:[%s5221_s9 + $0x78] sm:$0xff]  ;;  %v1850_v18 = vld [vmem:[%s5221_s9 + $0x70] sm:$0xff] }
 0x46a   :  { %v945_v22 = vmax.f32 %v944_v20, 0.0  ;;  %v1753_v20 = vld [vmem:[#allocation7 + $0x10] sm:$0xff] }
 0x46c   :  { %949 = vrot.lane.b32.xlu1 %v945_v22, %s4592_s19  ;;  %946 = vrot.lane.b32.xlu0 %v945_v22, %s4591_s18 }
 0x46d   :  { %4241 = vmatpush3.msra.mxu0 %v945_v22  ;;  %v1849_v22 = vld [vmem:[%s5221_s9 + $0x68] sm:$0xff] }
 0x46e   :  { %4243 = vmatmul.mubr.msk.f32.vlgmr.msra.gmra.mxu0 %vm133_vm1, %v955_v23  ;;  %4250 = vmatprep.subr.mxu0 %v4589_v3  ;;  %v1848_v23 = vld [vmem:[%s5221_s9 + $0x60] sm:$0xff] }
 0x46f   :  { %4252 = vmatprep.mubr.msk.f32.mxu0 %vm4590_vm0, %v4589_v3 }
 0x470   :  { %1266 = vperm.xlu1 %4492, %v3985_v24   ;;  %1258 = vperm.xlu0 %4491, %v3984_v25   ;;  %v1847_v24 = vld [vmem:[%s5221_s9 + $0x58] sm:$0xff]  ;;  %v1846_v25 = vld [vmem:[%s5221_s9 + $0x50] sm:$0xff] }
 0x4de   :  { %v950_v28 = vpop.permute.xlu1 %949  ;;  %v947_v29 = vpop.permute.xlu0 %946 }
 0x4df   :  { %4246 = vmatpush3.msk.msra.mxu1 %vm4699_vm3, %v947_v29  ;;  %4251 = vmatpush3.msk.msra.mxu0 %vm4712_vm5, %v950_v28  ;;  %v1843_v28 = vld [vmem:[%s5221_s9 + $0x38] sm:$0xff]  ;;  %v1842_v29 = vld [vmem:[%s5221_s9 + $0x30] sm:$0xff] }
 0x4e0   :  { %4248 = vmatmul.mubr.msk.f32.vlgmr.msra.gmra.mxu1 %vm133_vm1, %v953_v26  ;;  %4253 = vmatmul.mubr.msk.f32.vlgmr.msra.gmra.mxu0 %vm133_vm1, %v1103_v27  ;;  %v1845_v26 = vld [vmem:[%s5221_s9 + $0x48] sm:$0xff]  ;;  %v1844_v27 = vld [vmem:[%s5221_s9 + $0x40] sm:$0xff] }
 0x4e1   :  { %4255 = vmatprep.subr.mxu1 %v4589_v3  ;;  %4257 = vmatprep.mubr.msk.f32.mxu1 %vm4590_vm0, %v4589_v3 }
 0x4e2   :  { %4256 = vmatpush3.msra.mxu1 %v4754_v54  ;;  %4260 = vmatprep.subr.mxu0 %v4589_v3 }
 0x4e3   :  { %4262 = vmatprep.mubr.msk.f32.mxu0 %vm4590_vm0, %v4589_v3  ;;  %4265 = vmatprep.subr.mxu1 %v4589_v3 }
 0x4e4   :  { %4258 = vmatmul.mubr.msk.f32.vlgmr.msra.gmra.mxu1 %vm133_vm1, %v1179_v30  ;;  %v1841_v30 = vld [vmem:[%s5221_s9 + $0x28] sm:$0xff] }
 0x4e5   :  { %4267 = vmatprep.mubr.msk.f32.mxu1 %vm4590_vm0, %v4589_v3 }
 0x4eb   :  { %v1259_v41 = vpop.permute.xlu0 %1258  ;;  %v1267_v44 = vpop.permute.xlu1 %1266 }
 0x52e   :  { %v1025_v31 = vpop.f32.mrf.mxu0 }
 0x530   :  { %v4244_v32 = vpop.f32.mrf.mxu0 }
 0x531   :  { %v1839_v32 = vld [vmem:[%s5221_s9 + $0x18] sm:$0xff] }
 0x5a0   :  { %v1098_v33 = vpop.f32.mrf.mxu1  ;;  %v1173_v34 = vpop.f32.mrf.mxu0 }
 0x5a1   :  { %v1099_v35 = vadd.f32 %v1098_v33, %v1025_v31  ;;  %v1840_v31 = vld [vmem:[%s5221_s9 + $0x20] sm:$0xff] }
 0x5a2   :  { %v4249_v36 = vpop.f32.mrf.mxu1  ;;  %v4254_v37 = vpop.f32.mrf.mxu0 }
 0x5a3   :  { %v1177_v38 = vadd.f32 %v1173_v34, %v1099_v35  ;;  %v1838_v34 = vld [vmem:[%s5221_s9 + $0x10] sm:$0xff]  ;;  %v1837_v36 = vld [vmem:[%s5221_s9 + $0x8] sm:$0xff] }
 0x5a4   :  { %v1249_v39 = vpop.f32.mrf.mxu1 }
 0x5a5   :  { %v4810_v40 = vadd.f32 %v1249_v39, %v1177_v38 }
 0x5a6   :  { %v4259_v42 = vpop.f32.mrf.mxu1 }
 0x5a7   :  { %v1261_v43 = vmul.f32 %v1259_v41, %v4810_v40 }
 0x5a9   :  { %v1269_v45 = vadd.f32 %v1267_v44, %v1261_v43 }
 0x5ab   :  { %v1270_v46 = vmax.f32 %v1269_v45, 0.0 }
 0x5ad   :  { %1274 = vrot.lane.b32.xlu1 %v1270_v46, %s4592_s19  ;;  %1271 = vrot.lane.b32.xlu0 %v1270_v46, %s4591_s18 }
 0x5ae   :  { %4261 = vmatpush3.msra.mxu0 %v1270_v46 }
 0x5af   :  { %4263 = vmatmul.mubr.msk.f32.vlgmr.msra.gmra.mxu0 %vm133_vm1, %v1280_v47  ;;  %4270 = vmatprep.subr.mxu0 %v4589_v3 }
 0x5b0   :  { %4272 = vmatprep.mubr.msk.f32.mxu0 %vm4590_vm0, %v4589_v3 }
 0x5b1   :  { %1515 = vperm.xlu1 %4492, %v3994_v48   ;;  %1507 = vperm.xlu0 %4491, %v3993_v49  }
 0x5b5   :  { %1828 = vrot.lane.b32.xlu1 %v4754_v54, %s4591_s18 }
 0x5b9   :  { %1926 = vperm.xlu1 %4492, %v4003_v50  }
 0x61f   :  { %v1275_v53 = vpop.permute.xlu1 %1274  ;;  %v1272_v55 = vpop.permute.xlu0 %1271 }
 0x620   :  { %4266 = vmatpush3.msk.msra.mxu1 %vm4699_vm3, %v1272_v55  ;;  %4271 = vmatpush3.msk.msra.mxu0 %vm4712_vm5, %v1275_v53 }
 0x621   :  { %4268 = vmatmul.mubr.msk.f32.vlgmr.msra.gmra.mxu1 %vm133_vm1, %v1278_v51  ;;  %4273 = vmatmul.mubr.msk.f32.vlgmr.msra.gmra.mxu0 %vm133_vm1, %v1428_v52 }
 0x622   :  { %4275 = vmatprep.subr.mxu1 %v4589_v3  ;;  %4277 = vmatprep.mubr.msk.f32.mxu1 %vm4590_vm0, %v4589_v3 }
 0x623   :  { %4280 = vmatprep.subr.mxu0 %v4589_v3  ;;  %4282 = vmatprep.mubr.msk.f32.mxu0 %vm4590_vm0, %v4589_v3 }
 0x62c   :  { %v1508_v0 = vpop.permute.xlu0 %1507  ;;  %v1516_v2 = vpop.permute.xlu1 %1515 }
 0x630   :  { %v4853_v8 = vpop.permute.xlu1 %1828 }
 0x631   :  { %v1830_v35 = vsel %vm4693_vm2, -inf, %v4853_v8 }
 0x632   :  { %v1834_v38 = vmax.f32 %v1830_v35, %v4754_v54 }
 0x634   :  { %v4855_v9 = vpop.permute.xlu1 %1926 }
 0x66f   :  { %v1350_v56 = vpop.f32.mrf.mxu0 }
 0x671   :  { %v4264_v57 = vpop.f32.mrf.mxu0 }
 0x672   :  { %v4013_v57 = vld [vmem:[%s5214_s2 + $0x38] sm:$0xff] }
 0x6e1   :  { %v1423_v58 = vpop.f32.mrf.mxu1  ;;  %v1498_v59 = vpop.f32.mrf.mxu0 }
 0x6e2   :  { %v1424_v60 = vadd.f32 %v1423_v58, %v1350_v56  ;;  %v1948_v56 = vld [vmem:[#allocation5 + $0x98] sm:$0xff]  ;;  %v4012_v58 = vld [vmem:[%s5213_s1 + $0x38] sm:$0xff] }
 0x6e3   :  { %v4269_v61 = vpop.f32.mrf.mxu1  ;;  %v4274_v62 = vpop.f32.mrf.mxu0 }
 0x6e4   :  { %v1502_v63 = vadd.f32 %v1498_v59, %v1424_v60  ;;  %v98_v59 = vand.u32 7, %v4690_v14  ;;  %v1946_v61 = vld [vmem:[#allocation5 + $0x90] sm:$0xff]  ;;  %v2096_v14 = vld [vmem:[#allocation5 + $0xa0] sm:$0xff]  ;;  %v3084_v60 = vld [vmem:[%s5222_s10 + $0x70] sm:$0xff] }
 0x6e6   :  { %v1510_v1 = vmul.f32 %v1508_v0, %v1502_v63  ;;  %vm4965_vm6 = vcmp.ne.s32.totalorder %v98_v59, 0  ;;  %vm4969_vm7 = vcmp.ne.s32.totalorder %v98_v59, 7  ;;  %v3083_v63 = vld [vmem:[%s5222_s10 + $0x68] sm:$0xff] }
 0x6e8   :  { %v1518_v4 = vadd.f32 %v1516_v2, %v1510_v1 }
 0x6ea   :  { %v1519_v5 = vmax.f32 %v1518_v4, 0.0 }
 0x6ec   :  { %1520 = vrot.lane.b32.xlu1 %v1519_v5, %s4591_s18  ;;  %1523 = vrot.lane.b32.xlu0 %v1519_v5, %s4592_s19 }
 0x6ed   :  { %4276 = vmatpush3.msra.mxu1 %v1519_v5 }
 0x6ee   :  { %4278 = vmatmul.mubr.msk.f32.vlgmr.msra.gmra.mxu1 %vm133_vm1, %v1529_v6  ;;  %4285 = vmatprep.subr.mxu1 %v4589_v3 }
 0x6ef   :  { %4287 = vmatprep.mubr.msk.f32.mxu1 %vm4590_vm0, %v4589_v3 }
 0x6f0   :  { %1831 = vrot.lane.b32.xlu0 %v4754_v54, %s4592_s19 }
 0x6f4   :  { %1934 = vperm.xlu0 %4491, %v4004_v7  }
 0x75e   :  { %v1521_v12 = vpop.permute.xlu1 %1520  ;;  %v1524_v13 = vpop.permute.xlu0 %1523 }
 0x75f   :  { %4281 = vmatpush3.msk.msra.mxu0 %vm4699_vm3, %v1521_v12  ;;  %4286 = vmatpush3.msk.msra.mxu1 %vm4712_vm5, %v1524_v13 }
 0x760   :  { %4283 = vmatmul.mubr.msk.f32.vlgmr.msra.gmra.mxu0 %vm133_vm1, %v1527_v10  ;;  %4288 = vmatmul.mubr.msk.f32.vlgmr.msra.gmra.mxu1 %vm133_vm1, %v1677_v11 }
 0x761   :  { %4290 = vmatprep.subr.mxu0 %v4589_v3  ;;  %4295 = vmatprep.subr.mxu1 %v4589_v3 }
 0x762   :  { %4291 = vmatpush3.msra.mxu0 %v4810_v40  ;;  %4296 = vmatpush3.msra.mxu1 %v1851_v15  ;;  %v1832_v33 = vpop.permute.xlu0 %1831 }
 0x763   :  { %4297 = vmatprep.subr.mxu1 %v4589_v3  ;;  %4292 = vmatprep.mubr.msk.f32.mxu0 %vm4590_vm0, %v4589_v3  ;;  %v1833_v37 = vsel %vm4703_vm4, -inf, %v1832_v33 }
 0x764   :  { %4298 = vmatpush3.msra.mxu1 %v1850_v18  ;;  %4293 = vmatmul.mubr.msk.f32.vlgmr.msra.gmra.mxu0 %vm133_vm1, %v1753_v20  ;;  %v1835_v39 = vmax.f32 %v1834_v38, %v1833_v37  ;;  %v2197_v18 = vld [vmem:[#allocation5 + $0xb0] sm:$0xff]  ;;  %v4023_v20 = vld [vmem:[%s5214_s2 + $0x40] sm:$0xff] }
 0x765   :  { %4299 = vmatprep.subr.mxu1 %v4589_v3  ;;  %4327 = vmatprep.mubr.msk.f32.mxu1 %vm4590_vm0, %v4589_v3 }
 0x766   :  { %4300 = vmatpush3.msra.mxu1 %v1849_v22  ;;  %4330 = vmatprep.subr.mxu0 %v4589_v3  ;;  %v4022_v22 = vld [vmem:[%s5213_s1 + $0x40] sm:$0xff] }
 0x767   :  { %4301 = vmatprep.subr.mxu1 %v4589_v3  ;;  %4332 = vmatprep.mubr.msk.f32.mxu0 %vm4590_vm0, %v4589_v3 }
 0x768   :  { %4302 = vmatpush3.msra.mxu1 %v1848_v23  ;;  %v2195_v23 = vld [vmem:[#allocation5 + $0xa8] sm:$0xff] }
 0x769   :  { %4303 = vmatprep.subr.mxu1 %v4589_v3 }
 0x76a   :  { %4304 = vmatpush3.msra.mxu1 %v1847_v24 }
 0x76b   :  { %4305 = vmatprep.subr.mxu1 %v4589_v3 }
 0x76c   :  { %4306 = vmatpush3.msra.mxu1 %v1846_v25 }
 0x76d   :  { %4307 = vmatprep.subr.mxu1 %v4589_v3 }
 0x76e   :  { %4308 = vmatpush3.msra.mxu1 %v1845_v26  ;;  %v2345_v26 = vld [vmem:[#allocation5 + $0xb8] sm:$0xff] }
 0x76f   :  { %4309 = vmatprep.subr.mxu1 %v4589_v3  ;;  %v1935_v51 = vpop.permute.xlu0 %1934 }
 0x770   :  { %4310 = vmatpush3.msra.mxu1 %v1844_v27  ;;  %v2421_v27 = vld [vmem:[#allocation7 + $0x18] sm:$0xff] }
 0x771   :  { %4311 = vmatprep.subr.mxu1 %v4589_v3 }
 0x772   :  { %4312 = vmatpush3.msra.mxu1 %v1843_v28 }
 0x773   :  { %4313 = vmatprep.subr.mxu1 %v4589_v3 }
 0x774   :  { %4314 = vmatpush3.msra.mxu1 %v1842_v29 }
 0x775   :  { %4315 = vmatprep.subr.mxu1 %v4589_v3 }
 0x776   :  { %4316 = vmatpush3.msra.mxu1 %v1841_v30 }
 0x777   :  { %4317 = vmatprep.subr.mxu1 %v4589_v3 }
 0x778   :  { %4318 = vmatpush3.msra.mxu1 %v1840_v31 }
 0x779   :  { %4319 = vmatprep.subr.mxu1 %v4589_v3 }
 0x77a   :  { %4320 = vmatpush3.msra.mxu1 %v1839_v32 }
 0x77b   :  { %4321 = vmatprep.subr.mxu1 %v4589_v3 }
 0x77c   :  { %4322 = vmatpush3.msra.mxu1 %v1838_v34 }
 0x77d   :  { %4323 = vmatprep.subr.mxu1 %v4589_v3 }
 0x77e   :  { %4324 = vmatpush3.msra.mxu1 %v1837_v36 }
 0x77f   :  { %4325 = vmatprep.subr.mxu1 %v4589_v3 }
 0x780   :  { %4326 = vmatpush3.msra.mxu1 %v1836_v16 }
 0x781   :  { %4328 = vmatmul.mubr.f32.vlgmr.msra.gmra.mxu1 %v1835_v39  ;;  %4370 = vmatprep.subr.mxu1 %v4589_v3 }
 0x782   :  { %4372 = vmatprep.mubr.msk.f32.mxu1 %vm4590_vm0, %v4589_v3 }
 0x7ae   :  { %v1599_v19 = vpop.f32.mrf.mxu1 }
 0x7b0   :  { %v4279_v40 = vpop.f32.mrf.mxu1 }
 0x820   :  { %v1672_v54 = vpop.f32.mrf.mxu0  ;;  %v1747_v41 = vpop.f32.mrf.mxu1 }
 0x821   :  { %v1673_v42 = vadd.f32 %v1672_v54, %v1599_v19 }
 0x822   :  { %v4284_v43 = vpop.f32.mrf.mxu0  ;;  %v4289_v44 = vpop.f32.mrf.mxu1 }
 0x823   :  { %v1751_v45 = vadd.f32 %v1747_v41, %v1673_v42  ;;  %v2522_v41 = vld [vmem:[#allocation5 + $0xc8] sm:$0xff]  ;;  %v4032_v42 = vld [vmem:[%s5214_s2 + $0x48] sm:$0xff] }
 0x824   :  { %v1823_v46 = vpop.f32.mrf.mxu0  ;;  %v4031_v43 = vld [vmem:[%s5213_s1 + $0x48] sm:$0xff] }
 0x825   :  { %v4946_v47 = vadd.f32 %v1823_v46, %v1751_v45  ;;  %v2520_v44 = vld [vmem:[#allocation5 + $0xc0] sm:$0xff]  ;;  %v2670_v45 = vld [vmem:[#allocation5 + $0xd0] sm:$0xff] }
 0x826   :  { %v4294_v48 = vpop.f32.mrf.mxu0 }
 0x841   :  { %v4948_v49 = vpop.f32.mrf.mxu1 }
 0x842   :  { %v1929_v50 = vmul.f32 %v4855_v9, %v4948_v49 }
 0x843   :  { %v4329_v52 = vpop.f32.mrf.mxu1 }
 0x844   :  { %v1937_v53 = vadd.f32 %v1935_v51, %v1929_v50 }
 0x846   :  { %v1938_v55 = vmax.f32 %v1937_v53, 0.0 }
 0x848   :  { %1942 = vrot.lane.b32.xlu1 %v1938_v55, %s4592_s19  ;;  %1939 = vrot.lane.b32.xlu0 %v1938_v55, %s4591_s18 }
 0x849   :  { %4331 = vmatpush3.msra.mxu0 %v1938_v55 }
 0x84a   :  { %4333 = vmatmul.mubr.msk.f32.vlgmr.msra.gmra.mxu0 %vm133_vm1, %v1948_v56  ;;  %4335 = vmatprep.subr.mxu0 %v4589_v3 }
 0x84b   :  { %4337 = vmatprep.mubr.msk.f32.mxu0 %vm4590_vm0, %v4589_v3 }
 0x84c   :  { %2183 = vperm.xlu1 %4492, %v4013_v57   ;;  %2175 = vperm.xlu0 %4491, %v4012_v58  }
 0x8ba   :  { %v1940_v62 = vpop.permute.xlu0 %1939  ;;  %v1943_v0 = vpop.permute.xlu1 %1942 }
 0x8bb   :  { %4336 = vmatpush3.msk.msra.mxu0 %vm4965_vm6, %v1940_v62 }
 0x8bc   :  { %4338 = vmatmul.mubr.msk.f32.vlgmr.msra.gmra.mxu0 %vm133_vm1, %v1946_v61  ;;  %4340 = vmatprep.subr.mxu0 %v4589_v3 }
 0x8bd   :  { %4341 = vmatpush3.msk.msra.mxu0 %vm4969_vm7, %v1943_v0  ;;  %4342 = vmatprep.mubr.msk.f32.mxu0 %vm4590_vm0, %v4589_v3 }
 0x8be   :  { %4345 = vmatprep.subr.mxu0 %v4589_v3 }
 0x8c0   :  { %4343 = vmatmul.mubr.msk.f32.vlgmr.msra.gmra.mxu0 %vm133_vm1, %v2096_v14  ;;  %v2771_v14 = vld [vmem:[#allocation5 + $0xe0] sm:$0xff] }
 0x8c1   :  { %4347 = vmatprep.mubr.msk.f32.mxu0 %vm4590_vm0, %v4589_v3 }
 0x8c7   :  { %v2176_v9 = vpop.permute.xlu0 %2175  ;;  %v2184_v12 = vpop.permute.xlu1 %2183 }
 0x90a   :  { %v2018_v1 = vpop.f32.mrf.mxu0 }
 0x90c   :  { %v4334_v2 = vpop.f32.mrf.mxu0 }
 0x90d   :  { %v3156_v2 = vld [vmem:[%s5217_s5] sm:$0xff] }
 0x97c   :  { %v2091_v4 = vpop.f32.mrf.mxu0 }
 0x97d   :  { %v2092_v6 = vadd.f32 %v2091_v4, %v2018_v1  ;;  %v3163_v1 = vld [vmem:[%s5218_s6] sm:$0xff]  ;;  %v4042_v4 = vld [vmem:[%s5217_s5 + $0x8] sm:$0xff] }
 0x97e   :  { %v4339_v5 = vpop.f32.mrf.mxu0 }
 0x97f   :  { %v3172_v5 = vld [vmem:[%s5220_s8] sm:$0xff] }
 0x980   :  { %v2166_v7 = vpop.f32.mrf.mxu0 }
 0x981   :  { %v2170_v8 = vadd.f32 %v2166_v7, %v2092_v6  ;;  %v4045_v6 = vld [vmem:[%s5220_s8 + $0x8] sm:$0xff] }
 0x982   :  { %v4344_v10 = vpop.f32.mrf.mxu0  ;;  %v4043_v7 = vld [vmem:[%s5218_s6 + $0x8] sm:$0xff] }
 0x983   :  { %v2178_v11 = vmul.f32 %v2176_v9, %v2170_v8  ;;  %v4048_v8 = vld [vmem:[%s5214_s2 + $0x50] sm:$0xff]  ;;  %v2769_v10 = vld [vmem:[#allocation5 + $0xd8] sm:$0xff] }
 0x984   :  { %v4047_v9 = vld [vmem:[%s5213_s1 + $0x50] sm:$0xff] }
 0x985   :  { %v2186_v13 = vadd.f32 %v2184_v12, %v2178_v11  ;;  %v2919_v11 = vld [vmem:[#allocation5 + $0xe8] sm:$0xff] }
 0x987   :  { %v2187_v15 = vmax.f32 %v2186_v13, 0.0 }
 0x989   :  { %2191 = vrot.lane.b32.xlu1 %v2187_v15, %s4592_s19  ;;  %2188 = vrot.lane.b32.xlu0 %v2187_v15, %s4591_s18 }
 0x98a   :  { %4346 = vmatpush3.msra.mxu0 %v2187_v15  ;;  %v3085_v15 = vld [vmem:[%s5222_s10 + $0x78] sm:$0xff] }
 0x98b   :  { %4348 = vmatmul.mubr.msk.f32.vlgmr.msra.gmra.mxu0 %vm133_vm1, %v2197_v18  ;;  %4350 = vmatprep.subr.mxu0 %v4589_v3  ;;  %v2995_v18 = vld [vmem:[#allocation7 + $0x20] sm:$0xff] }
 0x98c   :  { %4352 = vmatprep.mubr.msk.f32.mxu0 %vm4590_vm0, %v4589_v3 }
 0x98d   :  { %2508 = vperm.xlu1 %4492, %v4023_v20   ;;  %2500 = vperm.xlu0 %4491, %v4022_v22   ;;  %v3082_v20 = vld [vmem:[%s5222_s10 + $0x60] sm:$0xff]  ;;  %v3081_v22 = vld [vmem:[%s5222_s10 + $0x58] sm:$0xff] }
 0x9fb   :  { %v2189_v24 = vpop.permute.xlu0 %2188  ;;  %v2192_v25 = vpop.permute.xlu1 %2191 }
 0x9fc   :  { %4351 = vmatpush3.msk.msra.mxu0 %vm4965_vm6, %v2189_v24  ;;  %v3079_v24 = vld [vmem:[%s5222_s10 + $0x48] sm:$0xff] }
 0x9fd   :  { %4353 = vmatmul.mubr.msk.f32.vlgmr.msra.gmra.mxu0 %vm133_vm1, %v2195_v23  ;;  %4355 = vmatprep.subr.mxu0 %v4589_v3  ;;  %v3080_v23 = vld [vmem:[%s5222_s10 + $0x50] sm:$0xff] }
 0x9fe   :  { %4356 = vmatpush3.msk.msra.mxu0 %vm4969_vm7, %v2192_v25  ;;  %4357 = vmatprep.mubr.msk.f32.mxu0 %vm4590_vm0, %v4589_v3  ;;  %v3078_v25 = vld [vmem:[%s5222_s10 + $0x40] sm:$0xff] }
 0x9ff   :  { %4360 = vmatprep.subr.mxu0 %v4589_v3 }
 0xa01   :  { %4358 = vmatmul.mubr.msk.f32.vlgmr.msra.gmra.mxu0 %vm133_vm1, %v2345_v26  ;;  %v3077_v26 = vld [vmem:[%s5222_s10 + $0x38] sm:$0xff] }
 0xa02   :  { %4361 = vmatpush3.msra.mxu0 %v4948_v49  ;;  %4362 = vmatprep.mubr.msk.f32.mxu0 %vm4590_vm0, %v4589_v3 }
 0xa03   :  { %4365 = vmatprep.subr.mxu0 %v4589_v3 }
 0xa05   :  { %4363 = vmatmul.mubr.msk.f32.vlgmr.msra.gmra.mxu0 %vm133_vm1, %v2421_v27  ;;  %v3076_v27 = vld [vmem:[%s5222_s10 + $0x30] sm:$0xff] }
 0xa06   :  { %4367 = vmatprep.mubr.msk.f32.mxu0 %vm4590_vm0, %v4589_v3 }
 0xa08   :  { %v2501_v38 = vpop.permute.xlu0 %2500  ;;  %v2509_v19 = vpop.permute.xlu1 %2508 }
 0xa4b   :  { %v2267_v28 = vpop.f32.mrf.mxu0 }
 0xa4d   :  { %v4349_v29 = vpop.f32.mrf.mxu0 }
 0xa4e   :  { %v3074_v29 = vld [vmem:[%s5222_s10 + $0x20] sm:$0xff] }
 0xabd   :  { %v2340_v30 = vpop.f32.mrf.mxu0 }
 0xabe   :  { %v2341_v33 = vadd.f32 %v2340_v30, %v2267_v28  ;;  %v3075_v28 = vld [vmem:[%s5222_s10 + $0x28] sm:$0xff]  ;;  %v3073_v30 = vld [vmem:[%s5222_s10 + $0x18] sm:$0xff] }
 0xabf   :  { %v4354_v31 = vpop.f32.mrf.mxu0 }
 0xac0   :  { %v3072_v31 = vld [vmem:[%s5222_s10 + $0x10] sm:$0xff] }
 0xac1   :  { %v2415_v32 = vpop.f32.mrf.mxu0 }
 0xac2   :  { %v2419_v35 = vadd.f32 %v2415_v32, %v2341_v33  ;;  %v3071_v32 = vld [vmem:[%s5222_s10 + $0x8] sm:$0xff]  ;;  %v3070_v33 = vld [vmem:[%s5222_s10] sm:$0xff] }
 0xac3   :  { %v4359_v34 = vpop.f32.mrf.mxu0 }
 0xac5   :  { %v2491_v36 = vpop.f32.mrf.mxu0 }
 0xac6   :  { %v5014_v37 = vadd.f32 %v2491_v36, %v2419_v35 }
 0xac7   :  { %v4364_v16 = vpop.f32.mrf.mxu0 }
 0xac8   :  { %v2503_v39 = vmul.f32 %v2501_v38, %v5014_v37 }
 0xaca   :  { %v2511_v40 = vadd.f32 %v2509_v19, %v2503_v39 }
 0xacc   :  { %v2512_v54 = vmax.f32 %v2511_v40, 0.0 }
 0xace   :  { %2516 = vrot.lane.b32.xlu1 %v2512_v54, %s4592_s19  ;;  %2513 = vrot.lane.b32.xlu0 %v2512_v54, %s4591_s18 }
 0xacf   :  { %4366 = vmatpush3.msra.mxu0 %v2512_v54 }
 0xad0   :  { %4368 = vmatmul.mubr.msk.f32.vlgmr.msra.gmra.mxu0 %vm133_vm1, %v2522_v41  ;;  %4375 = vmatprep.subr.mxu0 %v4589_v3 }
 0xad1   :  { %4377 = vmatprep.mubr.msk.f32.mxu0 %vm4590_vm0, %v4589_v3 }
 0xad2   :  { %2757 = vperm.xlu1 %4492, %v4032_v42   ;;  %2749 = vperm.xlu0 %4491, %v4031_v43  }
 0xb40   :  { %v2517_v46 = vpop.permute.xlu1 %2516  ;;  %v2514_v48 = vpop.permute.xlu0 %2513 }
 0xb41   :  { %4371 = vmatpush3.msk.msra.mxu1 %vm4965_vm6, %v2514_v48  ;;  %4376 = vmatpush3.msk.msra.mxu0 %vm4969_vm7, %v2517_v46 }
 0xb42   :  { %4373 = vmatmul.mubr.msk.f32.vlgmr.msra.gmra.mxu1 %vm133_vm1, %v2520_v44  ;;  %4378 = vmatmul.mubr.msk.f32.vlgmr.msra.gmra.mxu0 %vm133_vm1, %v2670_v45 }
 0xb43   :  { %4380 = vmatprep.subr.mxu1 %v4589_v3  ;;  %4382 = vmatprep.mubr.msk.f32.mxu1 %vm4590_vm0, %v4589_v3 }
 0xb44   :  { %4385 = vmatprep.subr.mxu0 %v4589_v3  ;;  %4387 = vmatprep.mubr.msk.f32.mxu0 %vm4590_vm0, %v4589_v3 }
 0xb4d   :  { %v2750_v58 = vpop.permute.xlu0 %2749  ;;  %v2758_v61 = vpop.permute.xlu1 %2757 }
 0xb90   :  { %v2592_v49 = vpop.f32.mrf.mxu0 }
 0xb92   :  { %v4369_v50 = vpop.f32.mrf.mxu0 }
 0xb93   :  { %v3171_v50 = vld [vmem:[%s5219_s7] sm:$0xff] }
 0xc02   :  { %v2665_v51 = vpop.f32.mrf.mxu1  ;;  %v2740_v52 = vpop.f32.mrf.mxu0 }
 0xc03   :  { %v2666_v53 = vadd.f32 %v2665_v51, %v2592_v49 }
 0xc04   :  { %v4374_v55 = vpop.f32.mrf.mxu1  ;;  %v4379_v56 = vpop.f32.mrf.mxu0 }
 0xc05   :  { %v2744_v57 = vadd.f32 %v2740_v52, %v2666_v53 }
 0xc07   :  { %v2752_v59 = vmul.f32 %v2750_v58, %v2744_v57 }
 0xc09   :  { %v2760_v62 = vadd.f32 %v2758_v61, %v2752_v59 }
 0xc0b   :  { %v2761_v0 = vmax.f32 %v2760_v62, 0.0  ;;  %v4044_v62 = vld [vmem:[%s5219_s7 + $0x8] sm:$0xff] }
 0xc0d   :  { %2765 = vrot.lane.b32.xlu1 %v2761_v0, %s4592_s19  ;;  %2762 = vrot.lane.b32.xlu0 %v2761_v0, %s4591_s18 }
 0xc0e   :  { %4381 = vmatpush3.msra.mxu1 %v2761_v0 }
 0xc0f   :  { %4383 = vmatmul.mubr.msk.f32.vlgmr.msra.gmra.mxu1 %vm133_vm1, %v2771_v14  ;;  %4390 = vmatprep.subr.mxu1 %v4589_v3 }
 0xc10   :  { %4392 = vmatprep.mubr.msk.f32.mxu1 %vm4590_vm0, %v4589_v3 }
 0xc11   :  { %3166 = vperm.xlu1 %4492, %v3163_v1   ;;  %3159 = vperm.xlu0 %4491, %v3156_v2  }
 0xc15   :  { %3255 = vperm.xlu1 %4492, %v4042_v4   ;;  %3175 = vperm.xlu0 %4491, %v3172_v5  }
 0xc19   :  { %3274 = vperm.xlu1 %4492, %v4045_v6   ;;  %3263 = vperm.xlu0 %4491, %v4043_v7  }
 0xc1d   :  { %3369 = vperm.xlu1 %4492, %v4048_v8   ;;  %3361 = vperm.xlu0 %4491, %v4047_v9  }
 0xc7f   :  { %v2766_v12 = vpop.permute.xlu1 %2765  ;;  %v2763_v13 = vpop.permute.xlu0 %2762 }
 0xc80   :  { %4386 = vmatpush3.msk.msra.mxu0 %vm4965_vm6, %v2763_v13  ;;  %4391 = vmatpush3.msk.msra.mxu1 %vm4969_vm7, %v2766_v12 }
 0xc81   :  { %4388 = vmatmul.mubr.msk.f32.vlgmr.msra.gmra.mxu0 %vm133_vm1, %v2769_v10  ;;  %4393 = vmatmul.mubr.msk.f32.vlgmr.msra.gmra.mxu1 %vm133_vm1, %v2919_v11 }
 0xc82   :  { %4395 = vmatprep.subr.mxu0 %v4589_v3  ;;  %4397 = vmatprep.mubr.msk.f32.mxu0 %vm4590_vm0, %v4589_v3 }
 0xc83   :  { %4396 = vmatpush3.msra.mxu0 %v5014_v37  ;;  %4400 = vmatprep.subr.mxu1 %v4589_v3 }
 0xc84   :  { %4401 = vmatpush3.msra.mxu1 %v3085_v15  ;;  %4432 = vmatprep.mubr.msk.f32.mxu1 %vm4590_vm0, %v4589_v3 }
 0xc85   :  { %4398 = vmatmul.mubr.msk.f32.vlgmr.msra.gmra.mxu0 %vm133_vm1, %v2995_v18  ;;  %4402 = vmatprep.subr.mxu1 %v4589_v3 }
 0xc86   :  { %4403 = vmatpush3.msra.mxu1 %v3084_v60  ;;  %4435 = vmatprep.subr.mxu0 %v4589_v3  ;;  %v3383_v60 = vld [vmem:[#allocation5 + $0xf8] sm:$0xff] }
 0xc87   :  { %4404 = vmatprep.subr.mxu1 %v4589_v3  ;;  %4437 = vmatprep.mubr.msk.f32.mxu0 %vm4590_vm0, %v4589_v3 }
 0xc88   :  { %4405 = vmatpush3.msra.mxu1 %v3083_v63  ;;  %v4057_v63 = vld [vmem:[%s5214_s2 + $0x58] sm:$0xff] }
 0xc89   :  { %4406 = vmatprep.subr.mxu1 %v4589_v3 }
 0xc8a   :  { %4407 = vmatpush3.msra.mxu1 %v3082_v20  ;;  %v3381_v20 = vld [vmem:[#allocation5 + $0xf0] sm:$0xff] }
 0xc8b   :  { %4408 = vmatprep.subr.mxu1 %v4589_v3 }
 0xc8c   :  { %4409 = vmatpush3.msra.mxu1 %v3081_v22  ;;  %v3160_v42 = vpop.permute.xlu0 %3159  ;;  %v3167_v45 = vpop.permute.xlu1 %3166 }
 0xc8d   :  { %4410 = vmatprep.subr.mxu1 %v4589_v3 }
 0xc8e   :  { %4411 = vmatpush3.msra.mxu1 %v3080_v23 }
 0xc8f   :  { %4412 = vmatprep.subr.mxu1 %v4589_v3 }
 0xc90   :  { %4413 = vmatpush3.msra.mxu1 %v3079_v24  ;;  %v3176_v51 = vpop.permute.xlu0 %3175  ;;  %v3256_v55 = vpop.permute.xlu1 %3255  ;;  %v3531_v24 = vld [vmem:[#allocation5 + $0x100] sm:$0xff] }
 0xc91   :  { %4414 = vmatprep.subr.mxu1 %v4589_v3 }
 0xc92   :  { %4415 = vmatpush3.msra.mxu1 %v3078_v25 }
 0xc93   :  { %4416 = vmatprep.subr.mxu1 %v4589_v3 }
 0xc94   :  { %4417 = vmatpush3.msra.mxu1 %v3077_v26  ;;  %v3264_v58 = vpop.permute.xlu0 %3263  ;;  %v3275_v0 = vpop.permute.xlu1 %3274 }
 0xc95   :  { %4418 = vmatprep.subr.mxu1 %v4589_v3 }
 0xc96   :  { %4419 = vmatpush3.msra.mxu1 %v3076_v27 }
 0xc97   :  { %4420 = vmatprep.subr.mxu1 %v4589_v3 }
 0xc98   :  { %4421 = vmatpush3.msra.mxu1 %v3075_v28  ;;  %v3362_v11 = vpop.permute.xlu0 %3361  ;;  %v3370_v13 = vpop.permute.xlu1 %3369 }
 0xc99   :  { %4422 = vmatprep.subr.mxu1 %v4589_v3 }
 0xc9a   :  { %4423 = vmatpush3.msra.mxu1 %v3074_v29 }
 0xc9b   :  { %4424 = vmatprep.subr.mxu1 %v4589_v3 }
 0xc9c   :  { %4425 = vmatpush3.msra.mxu1 %v3073_v30 }
 0xc9d   :  { %4426 = vmatprep.subr.mxu1 %v4589_v3 }
 0xc9e   :  { %4427 = vmatpush3.msra.mxu1 %v3072_v31 }
 0xc9f   :  { %4428 = vmatprep.subr.mxu1 %v4589_v3 }
 0xca0   :  { %4429 = vmatpush3.msra.mxu1 %v3071_v32  ;;  %v3856_v32 = vld [vmem:[#allocation7 + $0x28] sm:$0xff] }
 0xca1   :  { %4430 = vmatprep.subr.mxu1 %v4589_v3 }
 0xca2   :  { %4431 = vmatpush3.msra.mxu1 %v3070_v33 }
 0xca3   :  { %4475 = vmatprep.subr.mxu1 %v4589_v3 }
 0xccf   :  { %v2841_v34 = vpop.f32.mrf.mxu1 }
 0xcd1   :  { %v4384_v35 = vpop.f32.mrf.mxu1 }
 0xd41   :  { %v2914_v36 = vpop.f32.mrf.mxu0  ;;  %v2989_v37 = vpop.f32.mrf.mxu1 }
 0xd42   :  { %v2915_v38 = vadd.f32 %v2914_v36, %v2841_v34 }
 0xd43   :  { %v4389_v16 = vpop.f32.mrf.mxu0  ;;  %v4394_v39 = vpop.f32.mrf.mxu1 }
 0xd44   :  { %v2993_v19 = vadd.f32 %v2989_v37, %v2915_v38  ;;  %v3632_v16 = vld [vmem:[#allocation5 + $0x110] sm:$0xff]  ;;  %v3630_v39 = vld [vmem:[#allocation5 + $0x108] sm:$0xff] }
 0xd45   :  { %v3065_v40 = vpop.f32.mrf.mxu0 }
 0xd46   :  { %v3069_v54 = vadd.f32 %v3065_v40, %v2993_v19 }
 0xd47   :  { %v4399_v41 = vpop.f32.mrf.mxu0 }
 0xd48   :  { %4433 = vmatmul.mubr.f32.vlgmr.msra.gmra.mxu1 %v3069_v54  ;;  %v3780_v54 = vld [vmem:[#allocation5 + $0x118] sm:$0xff] }
 0xd49   :  { %4477 = vmatprep.mubr.msk.f32.mxu1 %vm4590_vm0, %v4589_v3 }
 0xe08   :  { %v3152_v43 = vpop.f32.mrf.mxu1 }
 0xe09   :  { %v3162_v44 = vmul.f32 %v3160_v42, %v3152_v43 }
 0xe0a   :  { %v4434_v46 = vpop.f32.mrf.mxu1 }
 0xe0b   :  { %v3169_v48 = vadd.f32 %v3167_v45, %v3162_v44 }
 0xe0d   :  { %v3170_v49 = vmax.f32 %v3169_v48, 0.0 }
 0xe0f   :  { %4436 = vmatpush3.msra.mxu0 %v3170_v49 }
 0xe10   :  { %4438 = vmatmul.mubr.msk.f32.vlgmr.msra.gmra.mxu0 %vm133_vm1, %v3171_v50  ;;  %4440 = vmatprep.subr.mxu0 %v4589_v3 }
 0xe11   :  { %4442 = vmatprep.mubr.msk.f32.mxu0 %vm4590_vm0, %v4589_v3 }
 0xed0   :  { %v3247_v52 = vpop.f32.mrf.mxu0 }
 0xed1   :  { %v3248_v53 = vadd.f32 %v3247_v52, %v3176_v51 }
 0xed2   :  { %v4439_v56 = vpop.f32.mrf.mxu0 }
 0xed3   :  { %v3258_v57 = vmul.f32 %v3256_v55, %v3248_v53 }
 0xed5   :  { %v3266_v59 = vadd.f32 %v3264_v58, %v3258_v57 }
 0xed7   :  { %v3267_v61 = vmax.f32 %v3266_v59, 0.0 }
 0xed9   :  { %4441 = vmatpush3.msra.mxu0 %v3267_v61 }
 0xeda   :  { %4443 = vmatmul.mubr.msk.f32.vlgmr.msra.gmra.mxu0 %vm133_vm1, %v4044_v62  ;;  %4445 = vmatprep.subr.mxu0 %v4589_v3 }
 0xedb   :  { %4447 = vmatprep.mubr.msk.f32.mxu0 %vm4590_vm0, %v4589_v3 }
 0xf9a   :  { %v3346_v14 = vpop.f32.mrf.mxu0 }
 0xf9b   :  { %v3347_v1 = vadd.f32 %v3346_v14, %v3275_v0 }
 0xf9c   :  { %v4444_v2 = vpop.f32.mrf.mxu0 }
 0xf9d   :  { %v3350_v4 = vsub.f32 0.0, %v3347_v1 }
 0xf9f   :  { %v3351_v5 = vmul.f32 1.442695, %v3350_v4 }
 0xfa1   :  { %4493 = vpow2.f32 %v3351_v5 }
 0xfae   :  { %v4494_v6 = vpop.eup %4493 }
 0xfaf   :  { %v3353_v7 = vadd.f32 1.0, %v4494_v6 }
 0xfb1   :  { %4495 = vrcp.f32 %v3353_v7 }
 0xfbe   :  { %v4496_v8 = vpop.eup %4495 }
 0xfbf   :  { %v3355_v9 = vadd.f32 1.0, %v4496_v8 }
 0xfc1   :  { %v3356_v10 = vmul.f32 %v3355_v9, %v4946_v47  ;;  %v4056_v47 = vld [vmem:[%s5213_s1 + $0x58] sm:$0xff]  ;;  %s4593_s1 = smov [#allocation8]  }
 0xfc2   :  { %s3938_s2 = sshll.u32 %s4593_s1, 4  ;;  %s3939_s2 = int_to_ptr.vmem [resolvable:$true] %s3938_s2 }
 0xfc3   :  { %4476 = vmatpush3.msra.mxu1 %v3356_v10  ;;  %v3364_v12 = vmul.f32 %v3362_v11, %v3356_v10  ;;  %p4562_p2 = scmp.lt.s32.totalorder %s3939_s2, %s3939_s2 }
 0xfc4   :  { %4478 = vmatmul.mubr.msk.f32.vlgmr.msra.gmra.mxu1 %vm133_vm1, %v3856_v32 }
 0xfc5   :  { %v3372_v15 = vadd.f32 %v3370_v13, %v3364_v12 }
 0xfc7   :  { %v3373_v18 = vmax.f32 %v3372_v15, 0.0 }
 0xfc9   :  { %3377 = vrot.lane.b32.xlu1 %v3373_v18, %s4592_s19  ;;  %3374 = vrot.lane.b32.xlu0 %v3373_v18, %s4591_s18 }
 0xfca   :  { %4446 = vmatpush3.msra.mxu0 %v3373_v18 }
 0xfcb   :  { %4448 = vmatmul.mubr.msk.f32.vlgmr.msra.gmra.mxu0 %vm133_vm1, %v3383_v60  ;;  %4450 = vmatprep.subr.mxu0 %v4589_v3 }
 0xfcc   :  { %4452 = vmatprep.mubr.msk.f32.mxu0 %vm4590_vm0, %v4589_v3 }
 0xfcd   :  { %3618 = vperm.xlu1 %4492, %v4057_v63   ;;  %3610 = vperm.xlu0 %4491, %v4056_v47  }
0x103b   :  { %v3375_v22 = vpop.permute.xlu0 %3374  ;;  %v3378_v23 = vpop.permute.xlu1 %3377 }
0x103c   :  { %4451 = vmatpush3.msk.msra.mxu0 %vm4699_vm3, %v3375_v22 }
0x103d   :  { %4453 = vmatmul.mubr.msk.f32.vlgmr.msra.gmra.mxu0 %vm133_vm1, %v3381_v20  ;;  %4455 = vmatprep.subr.mxu0 %v4589_v3 }
0x103e   :  { %4456 = vmatpush3.msk.msra.mxu0 %vm4712_vm5, %v3378_v23  ;;  %4457 = vmatprep.mubr.msk.f32.mxu0 %vm4590_vm0, %v4589_v3 }
0x103f   :  { %4460 = vmatprep.subr.mxu0 %v4589_v3 }
0x1041   :  { %4458 = vmatmul.mubr.msk.f32.vlgmr.msra.gmra.mxu0 %vm133_vm1, %v3531_v24 }
0x1042   :  { %4462 = vmatprep.mubr.msk.f32.mxu0 %vm4590_vm0, %v4589_v3 }
0x1048   :  { %v3611_v33 = vpop.permute.xlu0 %3610  ;;  %v3619_v36 = vpop.permute.xlu1 %3618 }
0x1084   :  { %v3926_v41 = vpop.f32.mrf.mxu1 }
0x1086   :  { %v4479_v42 = vpop.f32.mrf.mxu1 }
0x108b   :  { %v3453_v25 = vpop.f32.mrf.mxu0 }
0x108d   :  { %v4449_v26 = vpop.f32.mrf.mxu0 }
0x10fd   :  { %v3526_v27 = vpop.f32.mrf.mxu0 }
0x10fe   :  { %v3527_v29 = vadd.f32 %v3526_v27, %v3453_v25 }
0x10ff   :  { %v4454_v28 = vpop.f32.mrf.mxu0 }
0x1101   :  { %v3601_v30 = vpop.f32.mrf.mxu0 }
0x1102   :  { %v3605_v31 = vadd.f32 %v3601_v30, %v3527_v29 }
0x1103   :  { %v4459_v34 = vpop.f32.mrf.mxu0 }
0x1104   :  { %v3613_v35 = vmul.f32 %v3611_v33, %v3605_v31 }
0x1106   :  { %v3621_v37 = vadd.f32 %v3619_v36, %v3613_v35 }
0x1108   :  { %v3622_v38 = vmax.f32 %v3621_v37, 0.0 }
0x110a   :  { %3626 = vrot.lane.b32.xlu1 %v3622_v38, %s4592_s19  ;;  %3623 = vrot.lane.b32.xlu0 %v3622_v38, %s4591_s18  ;;  %s4557_s18 = scalar_lea.vmem %s3939_s2, 128 }
0x110b   :  { %4461 = vmatpush3.msra.mxu0 %v3622_v38  ;;  %p4558_p1 = scmp.ne.s32.totalorder %s3939_s2, %s4557_s18  ;;  %p4563_p3 = scmp.lt.s32.totalorder %s4557_s18, %s4557_s18 }
0x110c   :  { %4463 = vmatmul.mubr.msk.f32.vlgmr.msra.gmra.mxu0 %vm133_vm1, %v3632_v16  ;;  %4465 = vmatprep.subr.mxu0 %v4589_v3 }
0x110d   :  { %4467 = vmatprep.mubr.msk.f32.mxu0 %vm4590_vm0, %v4589_v3  ;;  %p4564_p4 = por %p4563_p3, %p4562_p2 }
0x110f   :  { %p4565_p5 = pnand %p4564_p4, %p4558_p1 }
0x117c   :  { %v3624_v19 = vpop.permute.xlu0 %3623  ;;  %v3627_v40 = vpop.permute.xlu1 %3626 }
0x117d   :  { %4466 = vmatpush3.msk.msra.mxu0 %vm4699_vm3, %v3624_v19 }
0x117e   :  { %4468 = vmatmul.mubr.msk.f32.vlgmr.msra.gmra.mxu0 %vm133_vm1, %v3630_v39  ;;  %4470 = vmatprep.subr.mxu0 %v4589_v3 }
0x117f   :  { %4471 = vmatpush3.msk.msra.mxu0 %vm4712_vm5, %v3627_v40  ;;  %4472 = vmatprep.mubr.msk.f32.mxu0 %vm4590_vm0, %v4589_v3 }
0x1182   :  { %4473 = vmatmul.mubr.msk.f32.vlgmr.msra.gmra.mxu0 %vm133_vm1, %v3780_v54 }
0x11cc   :  { %v3702_v43 = vpop.f32.mrf.mxu0 }
0x11ce   :  { %v4464_v44 = vpop.f32.mrf.mxu0 }
0x123e   :  { %v3775_v17 = vpop.f32.mrf.mxu0 }
0x123f   :  { %v3776_v46 = vadd.f32 %v3775_v17, %v3702_v43 }
0x1240   :  { %v4469_v45 = vpop.f32.mrf.mxu0 }
0x1242   :  { %v3850_v48 = vpop.f32.mrf.mxu0 }
0x1243   :  { %v3854_v49 = vadd.f32 %v3850_v48, %v3776_v46 }
0x1244   :  { %v4474_v50 = vpop.f32.mrf.mxu0 }
0x1245   :  { %v3930_v21 = vadd.f32 %v3926_v41, %v3854_v49 }
0x1247   :  { %3931 = vst [vmem:[#allocation8] sm:$0xff] %v3930_v21 }
0x1248   :  { %4568 = shalt.err (!%p4565_p5)
}
0x1249   :  { %3941 = dma.vmem_to_hbm [thread:$0]  %s3939_s2, 128, %s5223_s11, [#allocation4]  }
0x124a   :  { %4581 = dma.done.wait [#allocation4], 128  }
0x124b   :  { %4582 = vsyncadd [#allocation4], 4294967168 }
0x124c   :  { %3945 = vsyncpa [#allocation3], 1 }
0x124d   :  { %3946 = vsyncpa [#allocation6], 1 }
0x124e   :  { %3947 = vsyncpa [#allocation4], 1 }

</bundles_post_ra>
